<compile_context>
chip_gen: v7x
topology: tpu7x:2x2x1
jax: 0.10.0
libtpu: 0.0.40
codegen_flags: <defaults>
</compile_context>

<pallas_src>
import jax
import jax.numpy as jnp
from jax import lax
from jax.experimental import pallas as pl
from jax.experimental.pallas import tpu as pltpu

NEG_SLOPE = 0.3  # module default negative_slope


def _cnn_bilstm_kernel(xt_ref, cw_ref, wrow_ref, whh_ref, head_ref, fc2b_ref,
                       out_ref, gin_f_scr, gin_b_scr):
    # xt_ref  : (T*B, F) f32    time-major rows, row t*B+b = x[b, :, t]
    # cw_ref  : (F, 2)   f32    Conv1d(k=2) taps [w[:,0] | w[:,1]] (bias folded into b_in)
    # wrow_ref: (24, 8H) f32    rows 0/8/16 = w_in_fwd / w_in_bwd / b_in (0.5 folded in i/f/o cols)
    # whh_ref : (2H, 8H) bf16   block-diagonal recurrent weight, same column scaling
    # head_ref: (2H+16, H//2) f32  [fc1_w.T ; fc1_b (row 2H) ; fc2_w (row 2H+8)]
    # fc2b_ref: (1,) f32 SMEM   fc2 bias scalar
    # gin_*   : (T1, B, 8H) f32 per-timestep gate-input streams (fwd / bwd)
    T1, B, G = gin_f_scr.shape
    H = G // 8
    H2 = 2 * H

    # ---- prologue: Conv1d(k=2, stride=1) for all timesteps as one small matmul ----
    ab = jnp.dot(xt_ref[...], cw_ref[...],
                 preferred_element_type=jnp.float32)          # (T*B, 2)
    conv = ab[0:T1 * B, 0:1] + ab[B:, 1:2]                    # (T1*B, 1): tap t + tap t+1
    c3 = conv.reshape(T1, B, 1)

    wrow_f = wrow_ref[0:1, :]                                 # (1, 8H)
    wrow_b = wrow_ref[8:9, :]
    b_in = wrow_ref[16:17, :]
    gin_f_scr[...] = c3 * wrow_f[None, :, :] + b_in[None, :, :]
    gin_b_scr[...] = c3 * wrow_b[None, :, :]

    # ---- merged bidirectional LSTM recurrence (fully unrolled, 15 steps) ----
    # Gate columns: [i_f,i_b | f_f,f_b | o_f,o_b | g_f,g_b].  i/f/o pre-activations
    # are pre-scaled by 0.5, so one tanh over the full slab yields
    # sigmoid(z) = 0.5*tanh(z/2) + 0.5 for those gates.
    w_hh = whh_ref[...]                                       # (2H, 8H) bf16, hoisted
    # TODO(synk): per perf review, keeping w_hh resident in the MXU via
    # pltpu.matmul_push_rhs / matmul_acc_lhs / matmul_pop would shave the per-step
    # weight load; kept as jnp.dot here for lowering robustness.

    def step(t, carry):
        h, c = carry                                          # (B, 2H) each, [fwd | bwd]
        gin = gin_f_scr[t] + gin_b_scr[T1 - 1 - t]
        gates = gin + jnp.dot(h.astype(jnp.bfloat16), w_hh,
                              preferred_element_type=jnp.float32)   # (B, 8H) f32
        y = jnp.tanh(gates)                                   # single full-width EUP push
        i_g = 0.5 * y[:, 0:H2] + 0.5
        f_g = 0.5 * y[:, H2:2 * H2] + 0.5
        o_g = 0.5 * y[:, 2 * H2:3 * H2] + 0.5
        g_g = y[:, 3 * H2:]
        c = f_g * c + i_g * g_g
        h = o_g * jnp.tanh(c)
        return h, c

    zeros = jnp.zeros((B, H2), jnp.float32)
    h, _ = lax.fori_loop(0, T1, step, (zeros, zeros), unroll=True)
    # h == [h_fwd_final | h_bwd_final] == torch.cat((hidden[0], hidden[1]), dim=1)

    # ---- head: LeakyReLU -> fc1 -> LeakyReLU -> fc2 -> sigmoid (one-shot epilogue) ----
    fc1_w = head_ref[0:H2, :]                                 # (2H, H//2)
    fc1_b = head_ref[H2:H2 + 1, :]                            # (1, H//2)
    fc2_w = head_ref[H2 + 8:H2 + 9, :]                        # (1, H//2)
    fc2_b = fc2b_ref[0]

    rel = jnp.where(h >= 0, h, NEG_SLOPE * h)
    d1 = jnp.dot(rel, fc1_w, preferred_element_type=jnp.float32) + fc1_b
    r1 = jnp.where(d1 >= 0, d1, NEG_SLOPE * d1)
    d2 = jnp.sum(r1 * fc2_w, axis=-1, keepdims=True) + fc2_b  # (B, 1)
    out_ref[...] = jax.nn.sigmoid(d2)


def pack_params(params):
    """One-time packing of the 13 PyTorch tensors into 5 kernel slabs (hoisted
    out of the per-call path per the perf review)."""
    f32 = jnp.float32
    H = params['w_hh_f'].shape[1]
    conv_w = jnp.asarray(params['conv_w'], f32)               # (1, F, 2)
    cw0, cw1 = conv_w[0, :, 0], conv_w[0, :, 1]
    cb = jnp.asarray(params['conv_b'], f32)[0]
    cw = jnp.stack([cw0, cw1], axis=1)                        # (F, 2)

    def reorder(m):
        # PyTorch LSTM gate order [i, f, g, o] -> kernel order [i, f, o, g].
        return jnp.concatenate([m[..., 0:2 * H], m[..., 3 * H:4 * H],
                                m[..., 2 * H:3 * H]], axis=-1)

    def interleave(mf, mb):
        # -> columns [i_f,i_b | f_f,f_b | o_f,o_b | g_f,g_b]  (width 8H)
        parts = []
        for g in range(4):
            parts += [mf[..., g * H:(g + 1) * H], mb[..., g * H:(g + 1) * H]]
        return jnp.concatenate(parts, axis=-1)

    # sigmoid(z) = 0.5*tanh(z/2)+0.5 -> fold 0.5 into all i/f/o columns.
    col_scale = jnp.concatenate([jnp.full((6 * H,), 0.5, f32),
                                 jnp.ones((2 * H,), f32)])

    win_f = reorder(params['w_ih_f'][:, 0].astype(f32))       # (4H,)
    win_b = reorder(params['w_ih_b'][:, 0].astype(f32))
    b_f = reorder((params['b_ih_f'] + params['b_hh_f']).astype(f32)) + cb * win_f
    b_b = reorder((params['b_ih_b'] + params['b_hh_b']).astype(f32)) + cb * win_b

    z4 = jnp.zeros((4 * H,), f32)
    wrow_f = interleave(win_f, z4) * col_scale
    wrow_b = interleave(z4, win_b) * col_scale
    b_in = interleave(b_f, b_b) * col_scale

    def row_block(v):  # place one (8H,) row at an 8-sublane-aligned slot
        return jnp.concatenate([v[None, :], jnp.zeros((7, 8 * H), f32)], axis=0)
    wrow = jnp.concatenate([row_block(wrow_f), row_block(wrow_b), row_block(b_in)],
                           axis=0)                            # (24, 8H)

    zH = jnp.zeros((H, 4 * H), f32)
    whh = jnp.concatenate(
        [interleave(reorder(params['w_hh_f'].T.astype(f32)), zH),
         interleave(zH, reorder(params['w_hh_b'].T.astype(f32)))], axis=0)  # (2H, 8H)
    whh = (whh * col_scale[None, :]).astype(jnp.bfloat16)     # bf16 MXU operand

    Hh = H // 2
    head = jnp.concatenate([params['fc1_w'].T.astype(f32),    # (2H, Hh)
                            params['fc1_b'][None, :].astype(f32),
                            jnp.zeros((7, Hh), f32),
                            params['fc2_w'].astype(f32),
                            jnp.zeros((7, Hh), f32)], axis=0)  # (2H+16, Hh)

    fc2_b = jnp.asarray(params['fc2_b'], f32).reshape((1,))    # SMEM scalar
    return {'cw': cw, 'wrow': wrow, 'whh': whh, 'head': head, 'fc2_b': fc2_b}


def cnn_bilstm_classifier(x, packed):
    """x: (B, n_features, seq_len) f32; packed: pack_params(...). Returns (B, 1)."""
    B, F, T = x.shape
    T1 = T - 1
    G = packed['wrow'].shape[1]                                # 8H

    # Only per-call prep: one tiny transpose so the conv rows are time-major.
    xt = jnp.transpose(x, (2, 0, 1)).reshape(T * B, F).astype(jnp.float32)

    vmem = pl.BlockSpec(memory_space=pltpu.MemorySpace.VMEM)
    smem = pl.BlockSpec(memory_space=pltpu.MemorySpace.SMEM)
    return pl.pallas_call(
        _cnn_bilstm_kernel,
        out_shape=jax.ShapeDtypeStruct((B, 1), jnp.float32),
        in_specs=[vmem, vmem, vmem, vmem, vmem, smem],
        out_specs=vmem,
        scratch_shapes=[pltpu.VMEM((T1, B, G), jnp.float32),
                        pltpu.VMEM((T1, B, G), jnp.float32)],
    )(xt, packed['cw'], packed['wrow'], packed['whh'], packed['head'],
      packed['fc2_b'])


def reference(x, p):
    """Pure-JAX reference mirroring the PyTorch forward()."""
    B, F, T = x.shape
    T1 = T - 1
    H = p['w_hh_f'].shape[1]
    cw = p['conv_w'][0]                                        # (F, 2)
    conv = (jnp.einsum('bft,f->bt', x[:, :, :T1], cw[:, 0])
            + jnp.einsum('bft,f->bt', x[:, :, 1:], cw[:, 1])
            + p['conv_b'][0])                                  # (B, T1)

    def run_dir(seq, wih, whh, bih, bhh):
        def step(carry, x_t):
            h, c = carry
            gates = x_t[:, None] * wih[:, 0][None, :] + h @ whh.T + bih + bhh
            i = jax.nn.sigmoid(gates[:, :H])
            f = jax.nn.sigmoid(gates[:, H:2 * H])
            g = jnp.tanh(gates[:, 2 * H:3 * H])
            o = jax.nn.sigmoid(gates[:, 3 * H:])
            c = f * c + i * g
            h = o * jnp.tanh(c)
            return (h, c), None
        h0 = jnp.zeros((B, H), jnp.float32)
        (h, _), _ = lax.scan(step, (h0, h0), seq)
        return h

    seq = conv.T                                               # (T1, B)
    hf = run_dir(seq, p['w_ih_f'], p['w_hh_f'], p['b_ih_f'], p['b_hh_f'])
    hb = run_dir(seq[::-1], p['w_ih_b'], p['w_hh_b'], p['b_ih_b'], p['b_hh_b'])

    cat = jnp.concatenate([hf, hb], axis=1)
    rel = jnp.where(cat >= 0, cat, NEG_SLOPE * cat)
    d1 = rel @ p['fc1_w'].T + p['fc1_b']
    r1 = jnp.where(d1 >= 0, d1, NEG_SLOPE * d1)
    d2 = r1 @ p['fc2_w'].T + p['fc2_b']
    return jax.nn.sigmoid(d2)


if __name__ == "__main__":
    n_features, n_hidden, seq_len, n_layers = 4, 32, 16, 1
    B = 8
    H = n_hidden
    s = 1.0 / (H ** 0.5)

    key = jax.random.PRNGKey(0)
    ks = jax.random.split(key, 16)

    def u(k, shape, scale):
        return jax.random.uniform(k, shape, jnp.float32, -scale, scale)

    params = {
        'conv_w': u(ks[0], (1, n_features, 2), 0.5),   # Conv1d weight (out=1, in=F, k=2)
        'conv_b': u(ks[1], (1,), 0.5),
        'w_ih_f': u(ks[2], (4 * H, 1), s),             # weight_ih_l0
        'w_hh_f': u(ks[3], (4 * H, H), s),             # weight_hh_l0
        'b_ih_f': u(ks[4], (4 * H,), s),
        'b_hh_f': u(ks[5], (4 * H,), s),
        'w_ih_b': u(ks[6], (4 * H, 1), s),             # weight_ih_l0_reverse
        'w_hh_b': u(ks[7], (4 * H, H), s),
        'b_ih_b': u(ks[8], (4 * H,), s),
        'b_hh_b': u(ks[9], (4 * H,), s),
        'fc1_w': u(ks[10], (H // 2, 2 * H), 0.1),
        'fc1_b': u(ks[11], (H // 2,), 0.1),
        'fc2_w': u(ks[12], (1, H // 2), 0.2),
        'fc2_b': u(ks[13], (1,), 0.2),
    }
    x = jax.random.normal(ks[14], (B, n_features, seq_len), jnp.float32)

    packed = pack_params(params)                      # hoisted: done once, not per call
    fwd = jax.jit(cnn_bilstm_classifier)

    y = jax.block_until_ready(fwd(x, packed))
    y_ref = jax.block_until_ready(reference(x, params))

    assert y.shape == (B, 1)
    # bf16 recurrent-matmul operands compound over the 15 dependent steps, so the
    # tolerance is looser than f32; any structural bug produces O(0.1+) error.
    assert jnp.allclose(y, y_ref, atol=2e-2, rtol=2e-2), (y, y_ref)
    print("KERNEL_OK")
</pallas_src>

<mosaic_0001>
module attributes {stable_mosaic.version = 11 : i64} {
  func.func @_cnn_bilstm_kernel(%arg0: memref<128x4xf32, #tpu.memory_space<vmem>>, %arg1: memref<4x2xf32, #tpu.memory_space<vmem>>, %arg2: memref<24x256xf32, #tpu.memory_space<vmem>>, %arg3: memref<64x256xbf16, #tpu.memory_space<vmem>>, %arg4: memref<80x16xf32, #tpu.memory_space<vmem>>, %arg5: memref<1xf32, #tpu.memory_space<smem>>, %arg6: memref<8x1xf32, #tpu.memory_space<vmem>>, %arg7: memref<15x8x256xf32, #tpu.memory_space<vmem>>, %arg8: memref<15x8x256xf32, #tpu.memory_space<vmem>>) attributes {dimension_semantics = [], scalar_prefetch = 0 : i64, scratch_operands = 2 : i64, tpu.core_type = #tpu.core_type<tc>} {
    %c0 = arith.constant 0 : index
    %c0_0 = arith.constant 0 : index
    %0 = vector.load %arg0[%c0, %c0_0] : memref<128x4xf32, #tpu.memory_space<vmem>>, vector<128x4xf32>
    %c0_1 = arith.constant 0 : index
    %c0_2 = arith.constant 0 : index
    %1 = vector.load %arg1[%c0_1, %c0_2] : memref<4x2xf32, #tpu.memory_space<vmem>>, vector<4x2xf32>
    %cst = arith.constant dense<0.000000e+00> : vector<128x2xf32>
    %2 = tpu.matmul %0, %1, %cst {dimension_numbers = #tpu.dot_dimension_numbers<[1], [0], [0], [1], [0, 0, 1, 1], [], []>} : vector<128x4xf32>, vector<4x2xf32>, vector<128x2xf32> -> vector<128x2xf32>
    %3 = vector.extract_strided_slice %2 {offsets = [0, 0], sizes = [120, 1], strides = [1, 1]} : vector<128x2xf32> to vector<120x1xf32>
    %4 = vector.extract_strided_slice %2 {offsets = [8, 1], sizes = [120, 1], strides = [1, 1]} : vector<128x2xf32> to vector<120x1xf32>
    %5 = arith.addf %3, %4 : vector<120x1xf32>
    %6 = vector.shape_cast %5 : vector<120x1xf32> to vector<15x8x1xf32>
    %c0_3 = arith.constant 0 : index
    %c0_4 = arith.constant 0 : index
    %7 = vector.load %arg2[%c0_3, %c0_4] : memref<24x256xf32, #tpu.memory_space<vmem>>, vector<1x256xf32>
    %c8 = arith.constant 8 : index
    %c0_5 = arith.constant 0 : index
    %8 = vector.load %arg2[%c8, %c0_5] : memref<24x256xf32, #tpu.memory_space<vmem>>, vector<1x256xf32>
    %c16 = arith.constant 16 : index
    %c0_6 = arith.constant 0 : index
    %9 = vector.load %arg2[%c16, %c0_6] : memref<24x256xf32, #tpu.memory_space<vmem>>, vector<1x256xf32>
    %10 = vector.shape_cast %7 : vector<1x256xf32> to vector<1x1x256xf32>
    %11 = vector.broadcast %6 : vector<15x8x1xf32> to vector<15x8x256xf32>
    %12 = vector.broadcast %10 : vector<1x1x256xf32> to vector<15x8x256xf32>
    %13 = arith.mulf %11, %12 : vector<15x8x256xf32>
    %14 = vector.shape_cast %9 : vector<1x256xf32> to vector<1x1x256xf32>
    %15 = vector.broadcast %14 : vector<1x1x256xf32> to vector<15x8x256xf32>
    %16 = arith.addf %13, %15 : vector<15x8x256xf32>
    %c0_7 = arith.constant 0 : index
    %c0_8 = arith.constant 0 : index
    %c0_9 = arith.constant 0 : index
    %17 = vector.load %arg7[%c0_7, %c0_8, %c0_9] : memref<15x8x256xf32, #tpu.memory_space<vmem>>, vector<15x8x256xf32>
    tpu.vector_store %arg7[%c0_7, %c0_8, %c0_9], %16 {strides = array<i32>} : memref<15x8x256xf32, #tpu.memory_space<vmem>>, vector<15x8x256xf32>,
    %18 = vector.shape_cast %8 : vector<1x256xf32> to vector<1x1x256xf32>
    %19 = vector.broadcast %6 : vector<15x8x1xf32> to vector<15x8x256xf32>
    %20 = vector.broadcast %18 : vector<1x1x256xf32> to vector<15x8x256xf32>
    %21 = arith.mulf %19, %20 : vector<15x8x256xf32>
    %c0_10 = arith.constant 0 : index
    %c0_11 = arith.constant 0 : index
    %c0_12 = arith.constant 0 : index
    %22 = vector.load %arg8[%c0_10, %c0_11, %c0_12] : memref<15x8x256xf32, #tpu.memory_space<vmem>>, vector<15x8x256xf32>
    tpu.vector_store %arg8[%c0_10, %c0_11, %c0_12], %21 {strides = array<i32>} : memref<15x8x256xf32, #tpu.memory_space<vmem>>, vector<15x8x256xf32>,
    %c0_13 = arith.constant 0 : index
    %c0_14 = arith.constant 0 : index
    %23 = vector.load %arg3[%c0_13, %c0_14] : memref<64x256xbf16, #tpu.memory_space<vmem>>, vector<64x256xbf16>
    %cst_15 = arith.constant 0.000000e+00 : f32
    %24 = vector.broadcast %cst_15 : f32 to vector<8x64xf32>
    %c0_i32 = arith.constant 0 : i32
    %25 = arith.index_cast %c0_i32 : i32 to index
    %c0_16 = arith.constant 0 : index
    %c0_17 = arith.constant 0 : index
    %26 = vector.load %arg7[%25, %c0_16, %c0_17] : memref<15x8x256xf32, #tpu.memory_space<vmem>>, vector<1x8x256xf32>
    %27 = vector.shape_cast %26 : vector<1x8x256xf32> to vector<8x256xf32>
    %c14_i32 = arith.constant 14 : i32
    %28 = arith.subi %c14_i32, %c0_i32 : i32
    %29 = arith.index_cast %28 : i32 to index
    %c0_18 = arith.constant 0 : index
    %c0_19 = arith.constant 0 : index
    %30 = vector.load %arg8[%29, %c0_18, %c0_19] : memref<15x8x256xf32, #tpu.memory_space<vmem>>, vector<1x8x256xf32>
    %31 = vector.shape_cast %30 : vector<1x8x256xf32> to vector<8x256xf32>
    %32 = arith.addf %27, %31 : vector<8x256xf32>
    %33 = arith.truncf %24 : vector<8x64xf32> to vector<8x64xbf16>
    %cst_20 = arith.constant dense<0.000000e+00> : vector<8x256xf32>
    %34 = tpu.matmul %33, %23, %cst_20 {dimension_numbers = #tpu.dot_dimension_numbers<[1], [0], [0], [1], [0, 0, 1, 1], [], []>} : vector<8x64xbf16>, vector<64x256xbf16>, vector<8x256xf32> -> vector<8x256xf32>
    %35 = arith.addf %32, %34 : vector<8x256xf32>
    %36 = math.tanh %35 : vector<8x256xf32>
    %37 = vector.extract_strided_slice %36 {offsets = [0, 0], sizes = [8, 64], strides = [1, 1]} : vector<8x256xf32> to vector<8x64xf32>
    %cst_21 = arith.constant 5.000000e-01 : f32
    %38 = vector.broadcast %cst_21 : f32 to vector<8x64xf32>
    %39 = arith.mulf %38, %37 : vector<8x64xf32>
    %cst_22 = arith.constant 5.000000e-01 : f32
    %40 = vector.broadcast %cst_22 : f32 to vector<8x64xf32>
    %41 = arith.addf %39, %40 : vector<8x64xf32>
    %42 = vector.extract_strided_slice %36 {offsets = [0, 64], sizes = [8, 64], strides = [1, 1]} : vector<8x256xf32> to vector<8x64xf32>
    %cst_23 = arith.constant 5.000000e-01 : f32
    %43 = vector.broadcast %cst_23 : f32 to vector<8x64xf32>
    %44 = arith.mulf %43, %42 : vector<8x64xf32>
    %cst_24 = arith.constant 5.000000e-01 : f32
    %45 = vector.broadcast %cst_24 : f32 to vector<8x64xf32>
    %46 = arith.addf %44, %45 : vector<8x64xf32>
    %47 = vector.extract_strided_slice %36 {offsets = [0, 128], sizes = [8, 64], strides = [1, 1]} : vector<8x256xf32> to vector<8x64xf32>
    %cst_25 = arith.constant 5.000000e-01 : f32
    %48 = vector.broadcast %cst_25 : f32 to vector<8x64xf32>
    %49 = arith.mulf %48, %47 : vector<8x64xf32>
    %cst_26 = arith.constant 5.000000e-01 : f32
    %50 = vector.broadcast %cst_26 : f32 to vector<8x64xf32>
    %51 = arith.addf %49, %50 : vector<8x64xf32>
    %52 = vector.extract_strided_slice %36 {offsets = [0, 192], sizes = [8, 64], strides = [1, 1]} : vector<8x256xf32> to vector<8x64xf32>
    %53 = arith.mulf %46, %24 : vector<8x64xf32>
    %54 = arith.mulf %41, %52 : vector<8x64xf32>
    %55 = arith.addf %53, %54 : vector<8x64xf32>
    %56 = math.tanh %55 : vector<8x64xf32>
    %57 = arith.mulf %51, %56 : vector<8x64xf32>
    %c1_i32 = arith.constant 1 : i32
    %58 = arith.index_cast %c1_i32 : i32 to index
    %c0_27 = arith.constant 0 : index
    %c0_28 = arith.constant 0 : index
    %59 = vector.load %arg7[%58, %c0_27, %c0_28] : memref<15x8x256xf32, #tpu.memory_space<vmem>>, vector<1x8x256xf32>
    %60 = vector.shape_cast %59 : vector<1x8x256xf32> to vector<8x256xf32>
    %c14_i32_29 = arith.constant 14 : i32
    %61 = arith.subi %c14_i32_29, %c1_i32 : i32
    %62 = arith.index_cast %61 : i32 to index
    %c0_30 = arith.constant 0 : index
    %c0_31 = arith.constant 0 : index
    %63 = vector.load %arg8[%62, %c0_30, %c0_31] : memref<15x8x256xf32, #tpu.memory_space<vmem>>, vector<1x8x256xf32>
    %64 = vector.shape_cast %63 : vector<1x8x256xf32> to vector<8x256xf32>
    %65 = arith.addf %60, %64 : vector<8x256xf32>
    %66 = arith.truncf %57 : vector<8x64xf32> to vector<8x64xbf16>
    %cst_32 = arith.constant dense<0.000000e+00> : vector<8x256xf32>
    %67 = tpu.matmul %66, %23, %cst_32 {dimension_numbers = #tpu.dot_dimension_numbers<[1], [0], [0], [1], [0, 0, 1, 1], [], []>} : vector<8x64xbf16>, vector<64x256xbf16>, vector<8x256xf32> -> vector<8x256xf32>
    %68 = arith.addf %65, %67 : vector<8x256xf32>
    %69 = math.tanh %68 : vector<8x256xf32>
    %70 = vector.extract_strided_slice %69 {offsets = [0, 0], sizes = [8, 64], strides = [1, 1]} : vector<8x256xf32> to vector<8x64xf32>
    %cst_33 = arith.constant 5.000000e-01 : f32
    %71 = vector.broadcast %cst_33 : f32 to vector<8x64xf32>
    %72 = arith.mulf %71, %70 : vector<8x64xf32>
    %cst_34 = arith.constant 5.000000e-01 : f32
    %73 = vector.broadcast %cst_34 : f32 to vector<8x64xf32>
    %74 = arith.addf %72, %73 : vector<8x64xf32>
    %75 = vector.extract_strided_slice %69 {offsets = [0, 64], sizes = [8, 64], strides = [1, 1]} : vector<8x256xf32> to vector<8x64xf32>
    %cst_35 = arith.constant 5.000000e-01 : f32
    %76 = vector.broadcast %cst_35 : f32 to vector<8x64xf32>
    %77 = arith.mulf %76, %75 : vector<8x64xf32>
    %cst_36 = arith.constant 5.000000e-01 : f32
    %78 = vector.broadcast %cst_36 : f32 to vector<8x64xf32>
    %79 = arith.addf %77, %78 : vector<8x64xf32>
    %80 = vector.extract_strided_slice %69 {offsets = [0, 128], sizes = [8, 64], strides = [1, 1]} : vector<8x256xf32> to vector<8x64xf32>
    %cst_37 = arith.constant 5.000000e-01 : f32
    %81 = vector.broadcast %cst_37 : f32 to vector<8x64xf32>
    %82 = arith.mulf %81, %80 : vector<8x64xf32>
    %cst_38 = arith.constant 5.000000e-01 : f32
    %83 = vector.broadcast %cst_38 : f32 to vector<8x64xf32>
    %84 = arith.addf %82, %83 : vector<8x64xf32>
    %85 = vector.extract_strided_slice %69 {offsets = [0, 192], sizes = [8, 64], strides = [1, 1]} : vector<8x256xf32> to vector<8x64xf32>
    %86 = arith.mulf %79, %55 : vector<8x64xf32>
    %87 = arith.mulf %74, %85 : vector<8x64xf32>
    %88 = arith.addf %86, %87 : vector<8x64xf32>
    %89 = math.tanh %88 : vector<8x64xf32>
    %90 = arith.mulf %84, %89 : vector<8x64xf32>
    %c2_i32 = arith.constant 2 : i32
    %91 = arith.index_cast %c2_i32 : i32 to index
    %c0_39 = arith.constant 0 : index
    %c0_40 = arith.constant 0 : index
    %92 = vector.load %arg7[%91, %c0_39, %c0_40] : memref<15x8x256xf32, #tpu.memory_space<vmem>>, vector<1x8x256xf32>
    %93 = vector.shape_cast %92 : vector<1x8x256xf32> to vector<8x256xf32>
    %c14_i32_41 = arith.constant 14 : i32
    %94 = arith.subi %c14_i32_41, %c2_i32 : i32
    %95 = arith.index_cast %94 : i32 to index
    %c0_42 = arith.constant 0 : index
    %c0_43 = arith.constant 0 : index
    %96 = vector.load %arg8[%95, %c0_42, %c0_43] : memref<15x8x256xf32, #tpu.memory_space<vmem>>, vector<1x8x256xf32>
    %97 = vector.shape_cast %96 : vector<1x8x256xf32> to vector<8x256xf32>
    %98 = arith.addf %93, %97 : vector<8x256xf32>
    %99 = arith.truncf %90 : vector<8x64xf32> to vector<8x64xbf16>
    %cst_44 = arith.constant dense<0.000000e+00> : vector<8x256xf32>
    %100 = tpu.matmul %99, %23, %cst_44 {dimension_numbers = #tpu.dot_dimension_numbers<[1], [0], [0], [1], [0, 0, 1, 1], [], []>} : vector<8x64xbf16>, vector<64x256xbf16>, vector<8x256xf32> -> vector<8x256xf32>
    %101 = arith.addf %98, %100 : vector<8x256xf32>
    %102 = math.tanh %101 : vector<8x256xf32>
    %103 = vector.extract_strided_slice %102 {offsets = [0, 0], sizes = [8, 64], strides = [1, 1]} : vector<8x256xf32> to vector<8x64xf32>
    %cst_45 = arith.constant 5.000000e-01 : f32
    %104 = vector.broadcast %cst_45 : f32 to vector<8x64xf32>
    %105 = arith.mulf %104, %103 : vector<8x64xf32>
    %cst_46 = arith.constant 5.000000e-01 : f32
    %106 = vector.broadcast %cst_46 : f32 to vector<8x64xf32>
    %107 = arith.addf %105, %106 : vector<8x64xf32>
    %108 = vector.extract_strided_slice %102 {offsets = [0, 64], sizes = [8, 64], strides = [1, 1]} : vector<8x256xf32> to vector<8x64xf32>
    %cst_47 = arith.constant 5.000000e-01 : f32
    %109 = vector.broadcast %cst_47 : f32 to vector<8x64xf32>
    %110 = arith.mulf %109, %108 : vector<8x64xf32>
    %cst_48 = arith.constant 5.000000e-01 : f32
    %111 = vector.broadcast %cst_48 : f32 to vector<8x64xf32>
    %112 = arith.addf %110, %111 : vector<8x64xf32>
    %113 = vector.extract_strided_slice %102 {offsets = [0, 128], sizes = [8, 64], strides = [1, 1]} : vector<8x256xf32> to vector<8x64xf32>
    %cst_49 = arith.constant 5.000000e-01 : f32
    %114 = vector.broadcast %cst_49 : f32 to vector<8x64xf32>
    %115 = arith.mulf %114, %113 : vector<8x64xf32>
    %cst_50 = arith.constant 5.000000e-01 : f32
    %116 = vector.broadcast %cst_50 : f32 to vector<8x64xf32>
    %117 = arith.addf %115, %116 : vector<8x64xf32>
    %118 = vector.extract_strided_slice %102 {offsets = [0, 192], sizes = [8, 64], strides = [1, 1]} : vector<8x256xf32> to vector<8x64xf32>
    %119 = arith.mulf %112, %88 : vector<8x64xf32>
    %120 = arith.mulf %107, %118 : vector<8x64xf32>
    %121 = arith.addf %119, %120 : vector<8x64xf32>
    %122 = math.tanh %121 : vector<8x64xf32>
    %123 = arith.mulf %117, %122 : vector<8x64xf32>
    %c3_i32 = arith.constant 3 : i32
    %124 = arith.index_cast %c3_i32 : i32 to index
    %c0_51 = arith.constant 0 : index
    %c0_52 = arith.constant 0 : index
    %125 = vector.load %arg7[%124, %c0_51, %c0_52] : memref<15x8x256xf32, #tpu.memory_space<vmem>>, vector<1x8x256xf32>
    %126 = vector.shape_cast %125 : vector<1x8x256xf32> to vector<8x256xf32>
    %c14_i32_53 = arith.constant 14 : i32
    %127 = arith.subi %c14_i32_53, %c3_i32 : i32
    %128 = arith.index_cast %127 : i32 to index
    %c0_54 = arith.constant 0 : index
    %c0_55 = arith.constant 0 : index
    %129 = vector.load %arg8[%128, %c0_54, %c0_55] : memref<15x8x256xf32, #tpu.memory_space<vmem>>, vector<1x8x256xf32>
    %130 = vector.shape_cast %129 : vector<1x8x256xf32> to vector<8x256xf32>
    %131 = arith.addf %126, %130 : vector<8x256xf32>
    %132 = arith.truncf %123 : vector<8x64xf32> to vector<8x64xbf16>
    %cst_56 = arith.constant dense<0.000000e+00> : vector<8x256xf32>
    %133 = tpu.matmul %132, %23, %cst_56 {dimension_numbers = #tpu.dot_dimension_numbers<[1], [0], [0], [1], [0, 0, 1, 1], [], []>} : vector<8x64xbf16>, vector<64x256xbf16>, vector<8x256xf32> -> vector<8x256xf32>
    %134 = arith.addf %131, %133 : vector<8x256xf32>
    %135 = math.tanh %134 : vector<8x256xf32>
    %136 = vector.extract_strided_slice %135 {offsets = [0, 0], sizes = [8, 64], strides = [1, 1]} : vector<8x256xf32> to vector<8x64xf32>
    %cst_57 = arith.constant 5.000000e-01 : f32
    %137 = vector.broadcast %cst_57 : f32 to vector<8x64xf32>
    %138 = arith.mulf %137, %136 : vector<8x64xf32>
    %cst_58 = arith.constant 5.000000e-01 : f32
    %139 = vector.broadcast %cst_58 : f32 to vector<8x64xf32>
    %140 = arith.addf %138, %139 : vector<8x64xf32>
    %141 = vector.extract_strided_slice %135 {offsets = [0, 64], sizes = [8, 64], strides = [1, 1]} : vector<8x256xf32> to vector<8x64xf32>
    %cst_59 = arith.constant 5.000000e-01 : f32
    %142 = vector.broadcast %cst_59 : f32 to vector<8x64xf32>
    %143 = arith.mulf %142, %141 : vector<8x64xf32>
    %cst_60 = arith.constant 5.000000e-01 : f32
    %144 = vector.broadcast %cst_60 : f32 to vector<8x64xf32>
    %145 = arith.addf %143, %144 : vector<8x64xf32>
    %146 = vector.extract_strided_slice %135 {offsets = [0, 128], sizes = [8, 64], strides = [1, 1]} : vector<8x256xf32> to vector<8x64xf32>
    %cst_61 = arith.constant 5.000000e-01 : f32
    %147 = vector.broadcast %cst_61 : f32 to vector<8x64xf32>
    %148 = arith.mulf %147, %146 : vector<8x64xf32>
    %cst_62 = arith.constant 5.000000e-01 : f32
    %149 = vector.broadcast %cst_62 : f32 to vector<8x64xf32>
    %150 = arith.addf %148, %149 : vector<8x64xf32>
    %151 = vector.extract_strided_slice %135 {offsets = [0, 192], sizes = [8, 64], strides = [1, 1]} : vector<8x256xf32> to vector<8x64xf32>
    %152 = arith.mulf %145, %121 : vector<8x64xf32>
    %153 = arith.mulf %140, %151 : vector<8x64xf32>
    %154 = arith.addf %152, %153 : vector<8x64xf32>
    %155 = math.tanh %154 : vector<8x64xf32>
    %156 = arith.mulf %150, %155 : vector<8x64xf32>
    %c4_i32 = arith.constant 4 : i32
    %157 = arith.index_cast %c4_i32 : i32 to index
    %c0_63 = arith.constant 0 : index
    %c0_64 = arith.constant 0 : index
    %158 = vector.load %arg7[%157, %c0_63, %c0_64] : memref<15x8x256xf32, #tpu.memory_space<vmem>>, vector<1x8x256xf32>
    %159 = vector.shape_cast %158 : vector<1x8x256xf32> to vector<8x256xf32>
    %c14_i32_65 = arith.constant 14 : i32
    %160 = arith.subi %c14_i32_65, %c4_i32 : i32
    %161 = arith.index_cast %160 : i32 to index
    %c0_66 = arith.constant 0 : index
    %c0_67 = arith.constant 0 : index
    %162 = vector.load %arg8[%161, %c0_66, %c0_67] : memref<15x8x256xf32, #tpu.memory_space<vmem>>, vector<1x8x256xf32>
    %163 = vector.shape_cast %162 : vector<1x8x256xf32> to vector<8x256xf32>
    %164 = arith.addf %159, %163 : vector<8x256xf32>
    %165 = arith.truncf %156 : vector<8x64xf32> to vector<8x64xbf16>
    %cst_68 = arith.constant dense<0.000000e+00> : vector<8x256xf32>
    %166 = tpu.matmul %165, %23, %cst_68 {dimension_numbers = #tpu.dot_dimension_numbers<[1], [0], [0], [1], [0, 0, 1, 1], [], []>} : vector<8x64xbf16>, vector<64x256xbf16>, vector<8x256xf32> -> vector<8x256xf32>
    %167 = arith.addf %164, %166 : vector<8x256xf32>
    %168 = math.tanh %167 : vector<8x256xf32>
    %169 = vector.extract_strided_slice %168 {offsets = [0, 0], sizes = [8, 64], strides = [1, 1]} : vector<8x256xf32> to vector<8x64xf32>
    %cst_69 = arith.constant 5.000000e-01 : f32
    %170 = vector.broadcast %cst_69 : f32 to vector<8x64xf32>
    %171 = arith.mulf %170, %169 : vector<8x64xf32>
    %cst_70 = arith.constant 5.000000e-01 : f32
    %172 = vector.broadcast %cst_70 : f32 to vector<8x64xf32>
    %173 = arith.addf %171, %172 : vector<8x64xf32>
    %174 = vector.extract_strided_slice %168 {offsets = [0, 64], sizes = [8, 64], strides = [1, 1]} : vector<8x256xf32> to vector<8x64xf32>
    %cst_71 = arith.constant 5.000000e-01 : f32
    %175 = vector.broadcast %cst_71 : f32 to vector<8x64xf32>
    %176 = arith.mulf %175, %174 : vector<8x64xf32>
    %cst_72 = arith.constant 5.000000e-01 : f32
    %177 = vector.broadcast %cst_72 : f32 to vector<8x64xf32>
    %178 = arith.addf %176, %177 : vector<8x64xf32>
    %179 = vector.extract_strided_slice %168 {offsets = [0, 128], sizes = [8, 64], strides = [1, 1]} : vector<8x256xf32> to vector<8x64xf32>
    %cst_73 = arith.constant 5.000000e-01 : f32
    %180 = vector.broadcast %cst_73 : f32 to vector<8x64xf32>
    %181 = arith.mulf %180, %179 : vector<8x64xf32>
    %cst_74 = arith.constant 5.000000e-01 : f32
    %182 = vector.broadcast %cst_74 : f32 to vector<8x64xf32>
    %183 = arith.addf %181, %182 : vector<8x64xf32>
    %184 = vector.extract_strided_slice %168 {offsets = [0, 192], sizes = [8, 64], strides = [1, 1]} : vector<8x256xf32> to vector<8x64xf32>
    %185 = arith.mulf %178, %154 : vector<8x64xf32>
    %186 = arith.mulf %173, %184 : vector<8x64xf32>
    %187 = arith.addf %185, %186 : vector<8x64xf32>
    %188 = math.tanh %187 : vector<8x64xf32>
    %189 = arith.mulf %183, %188 : vector<8x64xf32>
    %c5_i32 = arith.constant 5 : i32
    %190 = arith.index_cast %c5_i32 : i32 to index
    %c0_75 = arith.constant 0 : index
    %c0_76 = arith.constant 0 : index
    %191 = vector.load %arg7[%190, %c0_75, %c0_76] : memref<15x8x256xf32, #tpu.memory_space<vmem>>, vector<1x8x256xf32>
    %192 = vector.shape_cast %191 : vector<1x8x256xf32> to vector<8x256xf32>
    %c14_i32_77 = arith.constant 14 : i32
    %193 = arith.subi %c14_i32_77, %c5_i32 : i32
    %194 = arith.index_cast %193 : i32 to index
    %c0_78 = arith.constant 0 : index
    %c0_79 = arith.constant 0 : index
    %195 = vector.load %arg8[%194, %c0_78, %c0_79] : memref<15x8x256xf32, #tpu.memory_space<vmem>>, vector<1x8x256xf32>
    %196 = vector.shape_cast %195 : vector<1x8x256xf32> to vector<8x256xf32>
    %197 = arith.addf %192, %196 : vector<8x256xf32>
    %198 = arith.truncf %189 : vector<8x64xf32> to vector<8x64xbf16>
    %cst_80 = arith.constant dense<0.000000e+00> : vector<8x256xf32>
    %199 = tpu.matmul %198, %23, %cst_80 {dimension_numbers = #tpu.dot_dimension_numbers<[1], [0], [0], [1], [0, 0, 1, 1], [], []>} : vector<8x64xbf16>, vector<64x256xbf16>, vector<8x256xf32> -> vector<8x256xf32>
    %200 = arith.addf %197, %199 : vector<8x256xf32>
    %201 = math.tanh %200 : vector<8x256xf32>
    %202 = vector.extract_strided_slice %201 {offsets = [0, 0], sizes = [8, 64], strides = [1, 1]} : vector<8x256xf32> to vector<8x64xf32>
    %cst_81 = arith.constant 5.000000e-01 : f32
    %203 = vector.broadcast %cst_81 : f32 to vector<8x64xf32>
    %204 = arith.mulf %203, %202 : vector<8x64xf32>
    %cst_82 = arith.constant 5.000000e-01 : f32
    %205 = vector.broadcast %cst_82 : f32 to vector<8x64xf32>
    %206 = arith.addf %204, %205 : vector<8x64xf32>
    %207 = vector.extract_strided_slice %201 {offsets = [0, 64], sizes = [8, 64], strides = [1, 1]} : vector<8x256xf32> to vector<8x64xf32>
    %cst_83 = arith.constant 5.000000e-01 : f32
    %208 = vector.broadcast %cst_83 : f32 to vector<8x64xf32>
    %209 = arith.mulf %208, %207 : vector<8x64xf32>
    %cst_84 = arith.constant 5.000000e-01 : f32
    %210 = vector.broadcast %cst_84 : f32 to vector<8x64xf32>
    %211 = arith.addf %209, %210 : vector<8x64xf32>
    %212 = vector.extract_strided_slice %201 {offsets = [0, 128], sizes = [8, 64], strides = [1, 1]} : vector<8x256xf32> to vector<8x64xf32>
    %cst_85 = arith.constant 5.000000e-01 : f32
    %213 = vector.broadcast %cst_85 : f32 to vector<8x64xf32>
    %214 = arith.mulf %213, %212 : vector<8x64xf32>
    %cst_86 = arith.constant 5.000000e-01 : f32
    %215 = vector.broadcast %cst_86 : f32 to vector<8x64xf32>
    %216 = arith.addf %214, %215 : vector<8x64xf32>
    %217 = vector.extract_strided_slice %201 {offsets = [0, 192], sizes = [8, 64], strides = [1, 1]} : vector<8x256xf32> to vector<8x64xf32>
    %218 = arith.mulf %211, %187 : vector<8x64xf32>
    %219 = arith.mulf %206, %217 : vector<8x64xf32>
    %220 = arith.addf %218, %219 : vector<8x64xf32>
    %221 = math.tanh %220 : vector<8x64xf32>
    %222 = arith.mulf %216, %221 : vector<8x64xf32>
    %c6_i32 = arith.constant 6 : i32
    %223 = arith.index_cast %c6_i32 : i32 to index
    %c0_87 = arith.constant 0 : index
    %c0_88 = arith.constant 0 : index
    %224 = vector.load %arg7[%223, %c0_87, %c0_88] : memref<15x8x256xf32, #tpu.memory_space<vmem>>, vector<1x8x256xf32>
    %225 = vector.shape_cast %224 : vector<1x8x256xf32> to vector<8x256xf32>
    %c14_i32_89 = arith.constant 14 : i32
    %226 = arith.subi %c14_i32_89, %c6_i32 : i32
    %227 = arith.index_cast %226 : i32 to index
    %c0_90 = arith.constant 0 : index
    %c0_91 = arith.constant 0 : index
    %228 = vector.load %arg8[%227, %c0_90, %c0_91] : memref<15x8x256xf32, #tpu.memory_space<vmem>>, vector<1x8x256xf32>
    %229 = vector.shape_cast %228 : vector<1x8x256xf32> to vector<8x256xf32>
    %230 = arith.addf %225, %229 : vector<8x256xf32>
    %231 = arith.truncf %222 : vector<8x64xf32> to vector<8x64xbf16>
    %cst_92 = arith.constant dense<0.000000e+00> : vector<8x256xf32>
    %232 = tpu.matmul %231, %23, %cst_92 {dimension_numbers = #tpu.dot_dimension_numbers<[1], [0], [0], [1], [0, 0, 1, 1], [], []>} : vector<8x64xbf16>, vector<64x256xbf16>, vector<8x256xf32> -> vector<8x256xf32>
    %233 = arith.addf %230, %232 : vector<8x256xf32>
    %234 = math.tanh %233 : vector<8x256xf32>
    %235 = vector.extract_strided_slice %234 {offsets = [0, 0], sizes = [8, 64], strides = [1, 1]} : vector<8x256xf32> to vector<8x64xf32>
    %cst_93 = arith.constant 5.000000e-01 : f32
    %236 = vector.broadcast %cst_93 : f32 to vector<8x64xf32>
    %237 = arith.mulf %236, %235 : vector<8x64xf32>
    %cst_94 = arith.constant 5.000000e-01 : f32
    %238 = vector.broadcast %cst_94 : f32 to vector<8x64xf32>
    %239 = arith.addf %237, %238 : vector<8x64xf32>
    %240 = vector.extract_strided_slice %234 {offsets = [0, 64], sizes = [8, 64], strides = [1, 1]} : vector<8x256xf32> to vector<8x64xf32>
    %cst_95 = arith.constant 5.000000e-01 : f32
    %241 = vector.broadcast %cst_95 : f32 to vector<8x64xf32>
    %242 = arith.mulf %241, %240 : vector<8x64xf32>
    %cst_96 = arith.constant 5.000000e-01 : f32
    %243 = vector.broadcast %cst_96 : f32 to vector<8x64xf32>
    %244 = arith.addf %242, %243 : vector<8x64xf32>
    %245 = vector.extract_strided_slice %234 {offsets = [0, 128], sizes = [8, 64], strides = [1, 1]} : vector<8x256xf32> to vector<8x64xf32>
    %cst_97 = arith.constant 5.000000e-01 : f32
    %246 = vector.broadcast %cst_97 : f32 to vector<8x64xf32>
    %247 = arith.mulf %246, %245 : vector<8x64xf32>
    %cst_98 = arith.constant 5.000000e-01 : f32
    %248 = vector.broadcast %cst_98 : f32 to vector<8x64xf32>
    %249 = arith.addf %247, %248 : vector<8x64xf32>
    %250 = vector.extract_strided_slice %234 {offsets = [0, 192], sizes = [8, 64], strides = [1, 1]} : vector<8x256xf32> to vector<8x64xf32>
    %251 = arith.mulf %244, %220 : vector<8x64xf32>
    %252 = arith.mulf %239, %250 : vector<8x64xf32>
    %253 = arith.addf %251, %252 : vector<8x64xf32>
    %254 = math.tanh %253 : vector<8x64xf32>
    %255 = arith.mulf %249, %254 : vector<8x64xf32>
    %c7_i32 = arith.constant 7 : i32
    %256 = arith.index_cast %c7_i32 : i32 to index
    %c0_99 = arith.constant 0 : index
    %c0_100 = arith.constant 0 : index
    %257 = vector.load %arg7[%256, %c0_99, %c0_100] : memref<15x8x256xf32, #tpu.memory_space<vmem>>, vector<1x8x256xf32>
    %258 = vector.shape_cast %257 : vector<1x8x256xf32> to vector<8x256xf32>
    %c14_i32_101 = arith.constant 14 : i32
    %259 = arith.subi %c14_i32_101, %c7_i32 : i32
    %260 = arith.index_cast %259 : i32 to index
    %c0_102 = arith.constant 0 : index
    %c0_103 = arith.constant 0 : index
    %261 = vector.load %arg8[%260, %c0_102, %c0_103] : memref<15x8x256xf32, #tpu.memory_space<vmem>>, vector<1x8x256xf32>
    %262 = vector.shape_cast %261 : vector<1x8x256xf32> to vector<8x256xf32>
    %263 = arith.addf %258, %262 : vector<8x256xf32>
    %264 = arith.truncf %255 : vector<8x64xf32> to vector<8x64xbf16>
    %cst_104 = arith.constant dense<0.000000e+00> : vector<8x256xf32>
    %265 = tpu.matmul %264, %23, %cst_104 {dimension_numbers = #tpu.dot_dimension_numbers<[1], [0], [0], [1], [0, 0, 1, 1], [], []>} : vector<8x64xbf16>, vector<64x256xbf16>, vector<8x256xf32> -> vector<8x256xf32>
    %266 = arith.addf %263, %265 : vector<8x256xf32>
    %267 = math.tanh %266 : vector<8x256xf32>
    %268 = vector.extract_strided_slice %267 {offsets = [0, 0], sizes = [8, 64], strides = [1, 1]} : vector<8x256xf32> to vector<8x64xf32>
    %cst_105 = arith.constant 5.000000e-01 : f32
    %269 = vector.broadcast %cst_105 : f32 to vector<8x64xf32>
    %270 = arith.mulf %269, %268 : vector<8x64xf32>
    %cst_106 = arith.constant 5.000000e-01 : f32
    %271 = vector.broadcast %cst_106 : f32 to vector<8x64xf32>
    %272 = arith.addf %270, %271 : vector<8x64xf32>
    %273 = vector.extract_strided_slice %267 {offsets = [0, 64], sizes = [8, 64], strides = [1, 1]} : vector<8x256xf32> to vector<8x64xf32>
    %cst_107 = arith.constant 5.000000e-01 : f32
    %274 = vector.broadcast %cst_107 : f32 to vector<8x64xf32>
    %275 = arith.mulf %274, %273 : vector<8x64xf32>
    %cst_108 = arith.constant 5.000000e-01 : f32
    %276 = vector.broadcast %cst_108 : f32 to vector<8x64xf32>
    %277 = arith.addf %275, %276 : vector<8x64xf32>
    %278 = vector.extract_strided_slice %267 {offsets = [0, 128], sizes = [8, 64], strides = [1, 1]} : vector<8x256xf32> to vector<8x64xf32>
    %cst_109 = arith.constant 5.000000e-01 : f32
    %279 = vector.broadcast %cst_109 : f32 to vector<8x64xf32>
    %280 = arith.mulf %279, %278 : vector<8x64xf32>
    %cst_110 = arith.constant 5.000000e-01 : f32
    %281 = vector.broadcast %cst_110 : f32 to vector<8x64xf32>
    %282 = arith.addf %280, %281 : vector<8x64xf32>
    %283 = vector.extract_strided_slice %267 {offsets = [0, 192], sizes = [8, 64], strides = [1, 1]} : vector<8x256xf32> to vector<8x64xf32>
    %284 = arith.mulf %277, %253 : vector<8x64xf32>
    %285 = arith.mulf %272, %283 : vector<8x64xf32>
    %286 = arith.addf %284, %285 : vector<8x64xf32>
    %287 = math.tanh %286 : vector<8x64xf32>
    %288 = arith.mulf %282, %287 : vector<8x64xf32>
    %c8_i32 = arith.constant 8 : i32
    %289 = arith.index_cast %c8_i32 : i32 to index
    %c0_111 = arith.constant 0 : index
    %c0_112 = arith.constant 0 : index
    %290 = vector.load %arg7[%289, %c0_111, %c0_112] : memref<15x8x256xf32, #tpu.memory_space<vmem>>, vector<1x8x256xf32>
    %291 = vector.shape_cast %290 : vector<1x8x256xf32> to vector<8x256xf32>
    %c14_i32_113 = arith.constant 14 : i32
    %292 = arith.subi %c14_i32_113, %c8_i32 : i32
    %293 = arith.index_cast %292 : i32 to index
    %c0_114 = arith.constant 0 : index
    %c0_115 = arith.constant 0 : index
    %294 = vector.load %arg8[%293, %c0_114, %c0_115] : memref<15x8x256xf32, #tpu.memory_space<vmem>>, vector<1x8x256xf32>
    %295 = vector.shape_cast %294 : vector<1x8x256xf32> to vector<8x256xf32>
    %296 = arith.addf %291, %295 : vector<8x256xf32>
    %297 = arith.truncf %288 : vector<8x64xf32> to vector<8x64xbf16>
    %cst_116 = arith.constant dense<0.000000e+00> : vector<8x256xf32>
    %298 = tpu.matmul %297, %23, %cst_116 {dimension_numbers = #tpu.dot_dimension_numbers<[1], [0], [0], [1], [0, 0, 1, 1], [], []>} : vector<8x64xbf16>, vector<64x256xbf16>, vector<8x256xf32> -> vector<8x256xf32>
    %299 = arith.addf %296, %298 : vector<8x256xf32>
    %300 = math.tanh %299 : vector<8x256xf32>
    %301 = vector.extract_strided_slice %300 {offsets = [0, 0], sizes = [8, 64], strides = [1, 1]} : vector<8x256xf32> to vector<8x64xf32>
    %cst_117 = arith.constant 5.000000e-01 : f32
    %302 = vector.broadcast %cst_117 : f32 to vector<8x64xf32>
    %303 = arith.mulf %302, %301 : vector<8x64xf32>
    %cst_118 = arith.constant 5.000000e-01 : f32
    %304 = vector.broadcast %cst_118 : f32 to vector<8x64xf32>
    %305 = arith.addf %303, %304 : vector<8x64xf32>
    %306 = vector.extract_strided_slice %300 {offsets = [0, 64], sizes = [8, 64], strides = [1, 1]} : vector<8x256xf32> to vector<8x64xf32>
    %cst_119 = arith.constant 5.000000e-01 : f32
    %307 = vector.broadcast %cst_119 : f32 to vector<8x64xf32>
    %308 = arith.mulf %307, %306 : vector<8x64xf32>
    %cst_120 = arith.constant 5.000000e-01 : f32
    %309 = vector.broadcast %cst_120 : f32 to vector<8x64xf32>
    %310 = arith.addf %308, %309 : vector<8x64xf32>
    %311 = vector.extract_strided_slice %300 {offsets = [0, 128], sizes = [8, 64], strides = [1, 1]} : vector<8x256xf32> to vector<8x64xf32>
    %cst_121 = arith.constant 5.000000e-01 : f32
    %312 = vector.broadcast %cst_121 : f32 to vector<8x64xf32>
    %313 = arith.mulf %312, %311 : vector<8x64xf32>
    %cst_122 = arith.constant 5.000000e-01 : f32
    %314 = vector.broadcast %cst_122 : f32 to vector<8x64xf32>
    %315 = arith.addf %313, %314 : vector<8x64xf32>
    %316 = vector.extract_strided_slice %300 {offsets = [0, 192], sizes = [8, 64], strides = [1, 1]} : vector<8x256xf32> to vector<8x64xf32>
    %317 = arith.mulf %310, %286 : vector<8x64xf32>
    %318 = arith.mulf %305, %316 : vector<8x64xf32>
    %319 = arith.addf %317, %318 : vector<8x64xf32>
    %320 = math.tanh %319 : vector<8x64xf32>
    %321 = arith.mulf %315, %320 : vector<8x64xf32>
    %c9_i32 = arith.constant 9 : i32
    %322 = arith.index_cast %c9_i32 : i32 to index
    %c0_123 = arith.constant 0 : index
    %c0_124 = arith.constant 0 : index
    %323 = vector.load %arg7[%322, %c0_123, %c0_124] : memref<15x8x256xf32, #tpu.memory_space<vmem>>, vector<1x8x256xf32>
    %324 = vector.shape_cast %323 : vector<1x8x256xf32> to vector<8x256xf32>
    %c14_i32_125 = arith.constant 14 : i32
    %325 = arith.subi %c14_i32_125, %c9_i32 : i32
    %326 = arith.index_cast %325 : i32 to index
    %c0_126 = arith.constant 0 : index
    %c0_127 = arith.constant 0 : index
    %327 = vector.load %arg8[%326, %c0_126, %c0_127] : memref<15x8x256xf32, #tpu.memory_space<vmem>>, vector<1x8x256xf32>
    %328 = vector.shape_cast %327 : vector<1x8x256xf32> to vector<8x256xf32>
    %329 = arith.addf %324, %328 : vector<8x256xf32>
    %330 = arith.truncf %321 : vector<8x64xf32> to vector<8x64xbf16>
    %cst_128 = arith.constant dense<0.000000e+00> : vector<8x256xf32>
    %331 = tpu.matmul %330, %23, %cst_128 {dimension_numbers = #tpu.dot_dimension_numbers<[1], [0], [0], [1], [0, 0, 1, 1], [], []>} : vector<8x64xbf16>, vector<64x256xbf16>, vector<8x256xf32> -> vector<8x256xf32>
    %332 = arith.addf %329, %331 : vector<8x256xf32>
    %333 = math.tanh %332 : vector<8x256xf32>
    %334 = vector.extract_strided_slice %333 {offsets = [0, 0], sizes = [8, 64], strides = [1, 1]} : vector<8x256xf32> to vector<8x64xf32>
    %cst_129 = arith.constant 5.000000e-01 : f32
    %335 = vector.broadcast %cst_129 : f32 to vector<8x64xf32>
    %336 = arith.mulf %335, %334 : vector<8x64xf32>
    %cst_130 = arith.constant 5.000000e-01 : f32
    %337 = vector.broadcast %cst_130 : f32 to vector<8x64xf32>
    %338 = arith.addf %336, %337 : vector<8x64xf32>
    %339 = vector.extract_strided_slice %333 {offsets = [0, 64], sizes = [8, 64], strides = [1, 1]} : vector<8x256xf32> to vector<8x64xf32>
    %cst_131 = arith.constant 5.000000e-01 : f32
    %340 = vector.broadcast %cst_131 : f32 to vector<8x64xf32>
    %341 = arith.mulf %340, %339 : vector<8x64xf32>
    %cst_132 = arith.constant 5.000000e-01 : f32
    %342 = vector.broadcast %cst_132 : f32 to vector<8x64xf32>
    %343 = arith.addf %341, %342 : vector<8x64xf32>
    %344 = vector.extract_strided_slice %333 {offsets = [0, 128], sizes = [8, 64], strides = [1, 1]} : vector<8x256xf32> to vector<8x64xf32>
    %cst_133 = arith.constant 5.000000e-01 : f32
    %345 = vector.broadcast %cst_133 : f32 to vector<8x64xf32>
    %346 = arith.mulf %345, %344 : vector<8x64xf32>
    %cst_134 = arith.constant 5.000000e-01 : f32
    %347 = vector.broadcast %cst_134 : f32 to vector<8x64xf32>
    %348 = arith.addf %346, %347 : vector<8x64xf32>
    %349 = vector.extract_strided_slice %333 {offsets = [0, 192], sizes = [8, 64], strides = [1, 1]} : vector<8x256xf32> to vector<8x64xf32>
    %350 = arith.mulf %343, %319 : vector<8x64xf32>
    %351 = arith.mulf %338, %349 : vector<8x64xf32>
    %352 = arith.addf %350, %351 : vector<8x64xf32>
    %353 = math.tanh %352 : vector<8x64xf32>
    %354 = arith.mulf %348, %353 : vector<8x64xf32>
    %c10_i32 = arith.constant 10 : i32
    %355 = arith.index_cast %c10_i32 : i32 to index
    %c0_135 = arith.constant 0 : index
    %c0_136 = arith.constant 0 : index
    %356 = vector.load %arg7[%355, %c0_135, %c0_136] : memref<15x8x256xf32, #tpu.memory_space<vmem>>, vector<1x8x256xf32>
    %357 = vector.shape_cast %356 : vector<1x8x256xf32> to vector<8x256xf32>
    %c14_i32_137 = arith.constant 14 : i32
    %358 = arith.subi %c14_i32_137, %c10_i32 : i32
    %359 = arith.index_cast %358 : i32 to index
    %c0_138 = arith.constant 0 : index
    %c0_139 = arith.constant 0 : index
    %360 = vector.load %arg8[%359, %c0_138, %c0_139] : memref<15x8x256xf32, #tpu.memory_space<vmem>>, vector<1x8x256xf32>
    %361 = vector.shape_cast %360 : vector<1x8x256xf32> to vector<8x256xf32>
    %362 = arith.addf %357, %361 : vector<8x256xf32>
    %363 = arith.truncf %354 : vector<8x64xf32> to vector<8x64xbf16>
    %cst_140 = arith.constant dense<0.000000e+00> : vector<8x256xf32>
    %364 = tpu.matmul %363, %23, %cst_140 {dimension_numbers = #tpu.dot_dimension_numbers<[1], [0], [0], [1], [0, 0, 1, 1], [], []>} : vector<8x64xbf16>, vector<64x256xbf16>, vector<8x256xf32> -> vector<8x256xf32>
    %365 = arith.addf %362, %364 : vector<8x256xf32>
    %366 = math.tanh %365 : vector<8x256xf32>
    %367 = vector.extract_strided_slice %366 {offsets = [0, 0], sizes = [8, 64], strides = [1, 1]} : vector<8x256xf32> to vector<8x64xf32>
    %cst_141 = arith.constant 5.000000e-01 : f32
    %368 = vector.broadcast %cst_141 : f32 to vector<8x64xf32>
    %369 = arith.mulf %368, %367 : vector<8x64xf32>
    %cst_142 = arith.constant 5.000000e-01 : f32
    %370 = vector.broadcast %cst_142 : f32 to vector<8x64xf32>
    %371 = arith.addf %369, %370 : vector<8x64xf32>
    %372 = vector.extract_strided_slice %366 {offsets = [0, 64], sizes = [8, 64], strides = [1, 1]} : vector<8x256xf32> to vector<8x64xf32>
    %cst_143 = arith.constant 5.000000e-01 : f32
    %373 = vector.broadcast %cst_143 : f32 to vector<8x64xf32>
    %374 = arith.mulf %373, %372 : vector<8x64xf32>
    %cst_144 = arith.constant 5.000000e-01 : f32
    %375 = vector.broadcast %cst_144 : f32 to vector<8x64xf32>
    %376 = arith.addf %374, %375 : vector<8x64xf32>
    %377 = vector.extract_strided_slice %366 {offsets = [0, 128], sizes = [8, 64], strides = [1, 1]} : vector<8x256xf32> to vector<8x64xf32>
    %cst_145 = arith.constant 5.000000e-01 : f32
    %378 = vector.broadcast %cst_145 : f32 to vector<8x64xf32>
    %379 = arith.mulf %378, %377 : vector<8x64xf32>
    %cst_146 = arith.constant 5.000000e-01 : f32
    %380 = vector.broadcast %cst_146 : f32 to vector<8x64xf32>
    %381 = arith.addf %379, %380 : vector<8x64xf32>
    %382 = vector.extract_strided_slice %366 {offsets = [0, 192], sizes = [8, 64], strides = [1, 1]} : vector<8x256xf32> to vector<8x64xf32>
    %383 = arith.mulf %376, %352 : vector<8x64xf32>
    %384 = arith.mulf %371, %382 : vector<8x64xf32>
    %385 = arith.addf %383, %384 : vector<8x64xf32>
    %386 = math.tanh %385 : vector<8x64xf32>
    %387 = arith.mulf %381, %386 : vector<8x64xf32>
    %c11_i32 = arith.constant 11 : i32
    %388 = arith.index_cast %c11_i32 : i32 to index
    %c0_147 = arith.constant 0 : index
    %c0_148 = arith.constant 0 : index
    %389 = vector.load %arg7[%388, %c0_147, %c0_148] : memref<15x8x256xf32, #tpu.memory_space<vmem>>, vector<1x8x256xf32>
    %390 = vector.shape_cast %389 : vector<1x8x256xf32> to vector<8x256xf32>
    %c14_i32_149 = arith.constant 14 : i32
    %391 = arith.subi %c14_i32_149, %c11_i32 : i32
    %392 = arith.index_cast %391 : i32 to index
    %c0_150 = arith.constant 0 : index
    %c0_151 = arith.constant 0 : index
    %393 = vector.load %arg8[%392, %c0_150, %c0_151] : memref<15x8x256xf32, #tpu.memory_space<vmem>>, vector<1x8x256xf32>
    %394 = vector.shape_cast %393 : vector<1x8x256xf32> to vector<8x256xf32>
    %395 = arith.addf %390, %394 : vector<8x256xf32>
    %396 = arith.truncf %387 : vector<8x64xf32> to vector<8x64xbf16>
    %cst_152 = arith.constant dense<0.000000e+00> : vector<8x256xf32>
    %397 = tpu.matmul %396, %23, %cst_152 {dimension_numbers = #tpu.dot_dimension_numbers<[1], [0], [0], [1], [0, 0, 1, 1], [], []>} : vector<8x64xbf16>, vector<64x256xbf16>, vector<8x256xf32> -> vector<8x256xf32>
    %398 = arith.addf %395, %397 : vector<8x256xf32>
    %399 = math.tanh %398 : vector<8x256xf32>
    %400 = vector.extract_strided_slice %399 {offsets = [0, 0], sizes = [8, 64], strides = [1, 1]} : vector<8x256xf32> to vector<8x64xf32>
    %cst_153 = arith.constant 5.000000e-01 : f32
    %401 = vector.broadcast %cst_153 : f32 to vector<8x64xf32>
    %402 = arith.mulf %401, %400 : vector<8x64xf32>
    %cst_154 = arith.constant 5.000000e-01 : f32
    %403 = vector.broadcast %cst_154 : f32 to vector<8x64xf32>
    %404 = arith.addf %402, %403 : vector<8x64xf32>
    %405 = vector.extract_strided_slice %399 {offsets = [0, 64], sizes = [8, 64], strides = [1, 1]} : vector<8x256xf32> to vector<8x64xf32>
    %cst_155 = arith.constant 5.000000e-01 : f32
    %406 = vector.broadcast %cst_155 : f32 to vector<8x64xf32>
    %407 = arith.mulf %406, %405 : vector<8x64xf32>
    %cst_156 = arith.constant 5.000000e-01 : f32
    %408 = vector.broadcast %cst_156 : f32 to vector<8x64xf32>
    %409 = arith.addf %407, %408 : vector<8x64xf32>
    %410 = vector.extract_strided_slice %399 {offsets = [0, 128], sizes = [8, 64], strides = [1, 1]} : vector<8x256xf32> to vector<8x64xf32>
    %cst_157 = arith.constant 5.000000e-01 : f32
    %411 = vector.broadcast %cst_157 : f32 to vector<8x64xf32>
    %412 = arith.mulf %411, %410 : vector<8x64xf32>
    %cst_158 = arith.constant 5.000000e-01 : f32
    %413 = vector.broadcast %cst_158 : f32 to vector<8x64xf32>
    %414 = arith.addf %412, %413 : vector<8x64xf32>
    %415 = vector.extract_strided_slice %399 {offsets = [0, 192], sizes = [8, 64], strides = [1, 1]} : vector<8x256xf32> to vector<8x64xf32>
    %416 = arith.mulf %409, %385 : vector<8x64xf32>
    %417 = arith.mulf %404, %415 : vector<8x64xf32>
    %418 = arith.addf %416, %417 : vector<8x64xf32>
    %419 = math.tanh %418 : vector<8x64xf32>
    %420 = arith.mulf %414, %419 : vector<8x64xf32>
    %c12_i32 = arith.constant 12 : i32
    %421 = arith.index_cast %c12_i32 : i32 to index
    %c0_159 = arith.constant 0 : index
    %c0_160 = arith.constant 0 : index
    %422 = vector.load %arg7[%421, %c0_159, %c0_160] : memref<15x8x256xf32, #tpu.memory_space<vmem>>, vector<1x8x256xf32>
    %423 = vector.shape_cast %422 : vector<1x8x256xf32> to vector<8x256xf32>
    %c14_i32_161 = arith.constant 14 : i32
    %424 = arith.subi %c14_i32_161, %c12_i32 : i32
    %425 = arith.index_cast %424 : i32 to index
    %c0_162 = arith.constant 0 : index
    %c0_163 = arith.constant 0 : index
    %426 = vector.load %arg8[%425, %c0_162, %c0_163] : memref<15x8x256xf32, #tpu.memory_space<vmem>>, vector<1x8x256xf32>
    %427 = vector.shape_cast %426 : vector<1x8x256xf32> to vector<8x256xf32>
    %428 = arith.addf %423, %427 : vector<8x256xf32>
    %429 = arith.truncf %420 : vector<8x64xf32> to vector<8x64xbf16>
    %cst_164 = arith.constant dense<0.000000e+00> : vector<8x256xf32>
    %430 = tpu.matmul %429, %23, %cst_164 {dimension_numbers = #tpu.dot_dimension_numbers<[1], [0], [0], [1], [0, 0, 1, 1], [], []>} : vector<8x64xbf16>, vector<64x256xbf16>, vector<8x256xf32> -> vector<8x256xf32>
    %431 = arith.addf %428, %430 : vector<8x256xf32>
    %432 = math.tanh %431 : vector<8x256xf32>
    %433 = vector.extract_strided_slice %432 {offsets = [0, 0], sizes = [8, 64], strides = [1, 1]} : vector<8x256xf32> to vector<8x64xf32>
    %cst_165 = arith.constant 5.000000e-01 : f32
    %434 = vector.broadcast %cst_165 : f32 to vector<8x64xf32>
    %435 = arith.mulf %434, %433 : vector<8x64xf32>
    %cst_166 = arith.constant 5.000000e-01 : f32
    %436 = vector.broadcast %cst_166 : f32 to vector<8x64xf32>
    %437 = arith.addf %435, %436 : vector<8x64xf32>
    %438 = vector.extract_strided_slice %432 {offsets = [0, 64], sizes = [8, 64], strides = [1, 1]} : vector<8x256xf32> to vector<8x64xf32>
    %cst_167 = arith.constant 5.000000e-01 : f32
    %439 = vector.broadcast %cst_167 : f32 to vector<8x64xf32>
    %440 = arith.mulf %439, %438 : vector<8x64xf32>
    %cst_168 = arith.constant 5.000000e-01 : f32
    %441 = vector.broadcast %cst_168 : f32 to vector<8x64xf32>
    %442 = arith.addf %440, %441 : vector<8x64xf32>
    %443 = vector.extract_strided_slice %432 {offsets = [0, 128], sizes = [8, 64], strides = [1, 1]} : vector<8x256xf32> to vector<8x64xf32>
    %cst_169 = arith.constant 5.000000e-01 : f32
    %444 = vector.broadcast %cst_169 : f32 to vector<8x64xf32>
    %445 = arith.mulf %444, %443 : vector<8x64xf32>
    %cst_170 = arith.constant 5.000000e-01 : f32
    %446 = vector.broadcast %cst_170 : f32 to vector<8x64xf32>
    %447 = arith.addf %445, %446 : vector<8x64xf32>
    %448 = vector.extract_strided_slice %432 {offsets = [0, 192], sizes = [8, 64], strides = [1, 1]} : vector<8x256xf32> to vector<8x64xf32>
    %449 = arith.mulf %442, %418 : vector<8x64xf32>
    %450 = arith.mulf %437, %448 : vector<8x64xf32>
    %451 = arith.addf %449, %450 : vector<8x64xf32>
    %452 = math.tanh %451 : vector<8x64xf32>
    %453 = arith.mulf %447, %452 : vector<8x64xf32>
    %c13_i32 = arith.constant 13 : i32
    %454 = arith.index_cast %c13_i32 : i32 to index
    %c0_171 = arith.constant 0 : index
    %c0_172 = arith.constant 0 : index
    %455 = vector.load %arg7[%454, %c0_171, %c0_172] : memref<15x8x256xf32, #tpu.memory_space<vmem>>, vector<1x8x256xf32>
    %456 = vector.shape_cast %455 : vector<1x8x256xf32> to vector<8x256xf32>
    %c14_i32_173 = arith.constant 14 : i32
    %457 = arith.subi %c14_i32_173, %c13_i32 : i32
    %458 = arith.index_cast %457 : i32 to index
    %c0_174 = arith.constant 0 : index
    %c0_175 = arith.constant 0 : index
    %459 = vector.load %arg8[%458, %c0_174, %c0_175] : memref<15x8x256xf32, #tpu.memory_space<vmem>>, vector<1x8x256xf32>
    %460 = vector.shape_cast %459 : vector<1x8x256xf32> to vector<8x256xf32>
    %461 = arith.addf %456, %460 : vector<8x256xf32>
    %462 = arith.truncf %453 : vector<8x64xf32> to vector<8x64xbf16>
    %cst_176 = arith.constant dense<0.000000e+00> : vector<8x256xf32>
    %463 = tpu.matmul %462, %23, %cst_176 {dimension_numbers = #tpu.dot_dimension_numbers<[1], [0], [0], [1], [0, 0, 1, 1], [], []>} : vector<8x64xbf16>, vector<64x256xbf16>, vector<8x256xf32> -> vector<8x256xf32>
    %464 = arith.addf %461, %463 : vector<8x256xf32>
    %465 = math.tanh %464 : vector<8x256xf32>
    %466 = vector.extract_strided_slice %465 {offsets = [0, 0], sizes = [8, 64], strides = [1, 1]} : vector<8x256xf32> to vector<8x64xf32>
    %cst_177 = arith.constant 5.000000e-01 : f32
    %467 = vector.broadcast %cst_177 : f32 to vector<8x64xf32>
    %468 = arith.mulf %467, %466 : vector<8x64xf32>
    %cst_178 = arith.constant 5.000000e-01 : f32
    %469 = vector.broadcast %cst_178 : f32 to vector<8x64xf32>
    %470 = arith.addf %468, %469 : vector<8x64xf32>
    %471 = vector.extract_strided_slice %465 {offsets = [0, 64], sizes = [8, 64], strides = [1, 1]} : vector<8x256xf32> to vector<8x64xf32>
    %cst_179 = arith.constant 5.000000e-01 : f32
    %472 = vector.broadcast %cst_179 : f32 to vector<8x64xf32>
    %473 = arith.mulf %472, %471 : vector<8x64xf32>
    %cst_180 = arith.constant 5.000000e-01 : f32
    %474 = vector.broadcast %cst_180 : f32 to vector<8x64xf32>
    %475 = arith.addf %473, %474 : vector<8x64xf32>
    %476 = vector.extract_strided_slice %465 {offsets = [0, 128], sizes = [8, 64], strides = [1, 1]} : vector<8x256xf32> to vector<8x64xf32>
    %cst_181 = arith.constant 5.000000e-01 : f32
    %477 = vector.broadcast %cst_181 : f32 to vector<8x64xf32>
    %478 = arith.mulf %477, %476 : vector<8x64xf32>
    %cst_182 = arith.constant 5.000000e-01 : f32
    %479 = vector.broadcast %cst_182 : f32 to vector<8x64xf32>
    %480 = arith.addf %478, %479 : vector<8x64xf32>
    %481 = vector.extract_strided_slice %465 {offsets = [0, 192], sizes = [8, 64], strides = [1, 1]} : vector<8x256xf32> to vector<8x64xf32>
    %482 = arith.mulf %475, %451 : vector<8x64xf32>
    %483 = arith.mulf %470, %481 : vector<8x64xf32>
    %484 = arith.addf %482, %483 : vector<8x64xf32>
    %485 = math.tanh %484 : vector<8x64xf32>
    %486 = arith.mulf %480, %485 : vector<8x64xf32>
    %c14_i32_183 = arith.constant 14 : i32
    %487 = arith.index_cast %c14_i32_183 : i32 to index
    %c0_184 = arith.constant 0 : index
    %c0_185 = arith.constant 0 : index
    %488 = vector.load %arg7[%487, %c0_184, %c0_185] : memref<15x8x256xf32, #tpu.memory_space<vmem>>, vector<1x8x256xf32>
    %489 = vector.shape_cast %488 : vector<1x8x256xf32> to vector<8x256xf32>
    %c14_i32_186 = arith.constant 14 : i32
    %490 = arith.subi %c14_i32_186, %c14_i32_183 : i32
    %491 = arith.index_cast %490 : i32 to index
    %c0_187 = arith.constant 0 : index
    %c0_188 = arith.constant 0 : index
    %492 = vector.load %arg8[%491, %c0_187, %c0_188] : memref<15x8x256xf32, #tpu.memory_space<vmem>>, vector<1x8x256xf32>
    %493 = vector.shape_cast %492 : vector<1x8x256xf32> to vector<8x256xf32>
    %494 = arith.addf %489, %493 : vector<8x256xf32>
    %495 = arith.truncf %486 : vector<8x64xf32> to vector<8x64xbf16>
    %cst_189 = arith.constant dense<0.000000e+00> : vector<8x256xf32>
    %496 = tpu.matmul %495, %23, %cst_189 {dimension_numbers = #tpu.dot_dimension_numbers<[1], [0], [0], [1], [0, 0, 1, 1], [], []>} : vector<8x64xbf16>, vector<64x256xbf16>, vector<8x256xf32> -> vector<8x256xf32>
    %497 = arith.addf %494, %496 : vector<8x256xf32>
    %498 = math.tanh %497 : vector<8x256xf32>
    %499 = vector.extract_strided_slice %498 {offsets = [0, 0], sizes = [8, 64], strides = [1, 1]} : vector<8x256xf32> to vector<8x64xf32>
    %cst_190 = arith.constant 5.000000e-01 : f32
    %500 = vector.broadcast %cst_190 : f32 to vector<8x64xf32>
    %501 = arith.mulf %500, %499 : vector<8x64xf32>
    %cst_191 = arith.constant 5.000000e-01 : f32
    %502 = vector.broadcast %cst_191 : f32 to vector<8x64xf32>
    %503 = arith.addf %501, %502 : vector<8x64xf32>
    %504 = vector.extract_strided_slice %498 {offsets = [0, 64], sizes = [8, 64], strides = [1, 1]} : vector<8x256xf32> to vector<8x64xf32>
    %cst_192 = arith.constant 5.000000e-01 : f32
    %505 = vector.broadcast %cst_192 : f32 to vector<8x64xf32>
    %506 = arith.mulf %505, %504 : vector<8x64xf32>
    %cst_193 = arith.constant 5.000000e-01 : f32
    %507 = vector.broadcast %cst_193 : f32 to vector<8x64xf32>
    %508 = arith.addf %506, %507 : vector<8x64xf32>
    %509 = vector.extract_strided_slice %498 {offsets = [0, 128], sizes = [8, 64], strides = [1, 1]} : vector<8x256xf32> to vector<8x64xf32>
    %cst_194 = arith.constant 5.000000e-01 : f32
    %510 = vector.broadcast %cst_194 : f32 to vector<8x64xf32>
    %511 = arith.mulf %510, %509 : vector<8x64xf32>
    %cst_195 = arith.constant 5.000000e-01 : f32
    %512 = vector.broadcast %cst_195 : f32 to vector<8x64xf32>
    %513 = arith.addf %511, %512 : vector<8x64xf32>
    %514 = vector.extract_strided_slice %498 {offsets = [0, 192], sizes = [8, 64], strides = [1, 1]} : vector<8x256xf32> to vector<8x64xf32>
    %515 = arith.mulf %508, %484 : vector<8x64xf32>
    %516 = arith.mulf %503, %514 : vector<8x64xf32>
    %517 = arith.addf %515, %516 : vector<8x64xf32>
    %518 = math.tanh %517 : vector<8x64xf32>
    %519 = arith.mulf %513, %518 : vector<8x64xf32>
    %c15_i32 = arith.constant 15 : i32
    %c0_196 = arith.constant 0 : index
    %c0_197 = arith.constant 0 : index
    %520 = vector.load %arg4[%c0_196, %c0_197] : memref<80x16xf32, #tpu.memory_space<vmem>>, vector<64x16xf32>
    %c64 = arith.constant 64 : index
    %c0_198 = arith.constant 0 : index
    %521 = vector.load %arg4[%c64, %c0_198] : memref<80x16xf32, #tpu.memory_space<vmem>>, vector<1x16xf32>
    %c72 = arith.constant 72 : index
    %c0_199 = arith.constant 0 : index
    %522 = vector.load %arg4[%c72, %c0_199] : memref<80x16xf32, #tpu.memory_space<vmem>>, vector<1x16xf32>
    %c0_200 = arith.constant 0 : index
    %523 = memref.load %arg5[%c0_200] : memref<1xf32, #tpu.memory_space<smem>>
    %cst_201 = arith.constant 0.000000e+00 : f32
    %524 = vector.broadcast %cst_201 : f32 to vector<8x64xf32>
    %525 = arith.cmpf oge, %519, %524 : vector<8x64xf32>
    %cst_202 = arith.constant 3.000000e-01 : f32
    %526 = vector.broadcast %cst_202 : f32 to vector<8x64xf32>
    %527 = arith.mulf %526, %519 : vector<8x64xf32>
    %528 = arith.select %525, %519, %527 : vector<8x64xi1>, vector<8x64xf32>
    %cst_203 = arith.constant dense<0.000000e+00> : vector<8x16xf32>
    %529 = tpu.matmul %528, %520, %cst_203 {dimension_numbers = #tpu.dot_dimension_numbers<[1], [0], [0], [1], [0, 0, 1, 1], [], []>} : vector<8x64xf32>, vector<64x16xf32>, vector<8x16xf32> -> vector<8x16xf32>
    %530 = vector.broadcast %521 : vector<1x16xf32> to vector<8x16xf32>
    %531 = arith.addf %529, %530 : vector<8x16xf32>
    %cst_204 = arith.constant 0.000000e+00 : f32
    %532 = vector.broadcast %cst_204 : f32 to vector<8x16xf32>
    %533 = arith.cmpf oge, %531, %532 : vector<8x16xf32>
    %cst_205 = arith.constant 3.000000e-01 : f32
    %534 = vector.broadcast %cst_205 : f32 to vector<8x16xf32>
    %535 = arith.mulf %534, %531 : vector<8x16xf32>
    %536 = arith.select %533, %531, %535 : vector<8x16xi1>, vector<8x16xf32>
    %537 = vector.broadcast %522 : vector<1x16xf32> to vector<8x16xf32>
    %538 = arith.mulf %536, %537 : vector<8x16xf32>
    %cst_206 = arith.constant dense<0.000000e+00> : vector<8xf32>
    %539 = vector.multi_reduction <add>, %538, %cst_206 [1] : vector<8x16xf32> to vector<8xf32>
    %540 = vector.shape_cast %539 : vector<8xf32> to vector<8x1xf32>
    %541 = vector.broadcast %523 : f32 to vector<8x1xf32>
    %542 = arith.addf %540, %541 : vector<8x1xf32>
    %543 = arith.negf %542 : vector<8x1xf32>
    %544 = math.exp %543 : vector<8x1xf32>
    %cst_207 = arith.constant 1.000000e+00 : f32
    %545 = vector.broadcast %cst_207 : f32 to vector<8x1xf32>
    %546 = arith.addf %545, %544 : vector<8x1xf32>
    %547 = arith.divf %545, %546 : vector<8x1xf32>
    %c0_208 = arith.constant 0 : index
    %c0_209 = arith.constant 0 : index
    %548 = vector.load %arg6[%c0_208, %c0_209] : memref<8x1xf32, #tpu.memory_space<vmem>>, vector<8x1xf32>
    tpu.vector_store %arg6[%c0_208, %c0_209], %547 {strides = array<i32>} : memref<8x1xf32, #tpu.memory_space<vmem>>, vector<8x1xf32>,
    return
  }
}

</mosaic_0001>

<bundles_post_ra>
// kernel: cnn_bilstm_classifier.1
= control target key start
LH: loop header
LB: loop body
LE: loop exit
PB: predicated region body
PF: predicated region fallthrough
CT: control target
= control target key end

     0   :  { %vm91_vm0 = vcmask 1043456   ;;  %vm42_vm1 = vcmask 31744   ;;  %v2161_v18 = vmov 0   ;;  %s2162_s20 = smov 127   ;;  %v396_v36 = vlaneseq  ;;  %s2845_s1 = inlined_call_operand.vmem [shape: f32[4,2], index: 1, kind: input, shape index: {}]   ;;  %s2846_s0 = inlined_call_operand.vmem [shape: f32[128,4], index: 0, kind: input, shape index: {}]   ;;  %s2847_s3 = inlined_call_operand.vmem [shape: bf16[64,256], index: 3, kind: input, shape index: {}]   ;;  %s2848_s2 = inlined_call_operand.vmem [shape: f32[24,256], index: 2, kind: input, shape index: {}]   ;;  %s2849_s4 = inlined_call_operand.vmem [shape: f32[80,16], index: 4, kind: input, shape index: {}]   ;;  %s2850_s5 = inlined_call_operand.<no memory space> [shape: f32[1], index: 5, kind: input, shape index: {}]   ;;  %s2851_s6 = inlined_call_operand.vmem [shape: f32[8,1], index: 6, kind: output, shape index: {}]  }
   0x1   :  { %v41_v0 = vld [vmem:[%s2845_s1] sm:$0xf]  ;;  %v26_v2 = vld [vmem:[%s2846_s0 + $0x8] sm:$0xff]  ;;  %v27_v3 = vld [vmem:[%s2846_s0 + $0x10] sm:$0xff]  ;;  %669 = vmatprep.mubr.bf16.mxu1 %v2161_v18  ;;  %2045 = vset.pattern.permute.xlu1 %v2161_v18  ;;  %vm633_vm2 = vcmask 523264   ;;  %vm2165_vm3 = vmmov 0  }
   0x2   :  { %v25_v1 = vld [vmem:[%s2846_s0] sm:$0xff]  ;;  %1982 = vmatprep.subr.msk.mxu0 %vm91_vm0, %v41_v0  ;;  %v28_v4 = vld [vmem:[%s2846_s0 + $0x18] sm:$0xff]  ;;  %v30_v6 = vld [vmem:[%s2846_s0 + $0x28] sm:$0xff]  ;;  %2046 = vset.pattern.permute.xlu0 %v2161_v18  ;;  %v397_v38 = vshrl.u32 %v396_v36, 7  ;;  %vm1893_vm6 = vcmask 130048   ;;  %vm1905_vm7 = vcmask 7168  }
   0x3   :  { %1984 = vmatprep.mubr.msk.f32.mxu0 %vm42_vm1, %v25_v1  ;;  %1983 = vmatpush3.msk.msra.mxu0 %vm91_vm0, %v41_v0  ;;  %v29_v5 = vld [vmem:[%s2846_s0 + $0x20] sm:$0xff]  ;;  %v31_v7 = vld [vmem:[%s2846_s0 + $0x30] sm:$0xff]  ;;  %v32_v8 = vld [vmem:[%s2846_s0 + $0x38] sm:$0xff] }
   0x4   :  { %1985 = vmatmul.mubr.msk.f32.vlgmr.msra.gmra.mrb[0].mxu0 %vm42_vm1, %v26_v2  ;;  %v33_v9 = vld [vmem:[%s2846_s0 + $0x40] sm:$0xff]  ;;  %v34_v10 = vld [vmem:[%s2846_s0 + $0x48] sm:$0xff]  ;;  %v35_v11 = vld [vmem:[%s2846_s0 + $0x50] sm:$0xff]  ;;  %v398_v41 = vsub.s32 0, %v397_v38  ;;  %v402_v57 = vsub.s32 1, %v397_v38 }
   0x5   :  { %1987 = vmatprep.mubr.msk.f32.mxu0 %vm42_vm1, %v27_v3  ;;  %v36_v12 = vld [vmem:[%s2846_s0 + $0x58] sm:$0xff]  ;;  %v37_v13 = vld [vmem:[%s2846_s0 + $0x60] sm:$0xff]  ;;  %v38_v14 = vld [vmem:[%s2846_s0 + $0x68] sm:$0xff] }
   0x6   :  { %v39_v15 = vld [vmem:[%s2846_s0 + $0x70] sm:$0xff]  ;;  %v40_v16 = vld [vmem:[%s2846_s0 + $0x78] sm:$0xff]  ;;  %v2272_v17 = vld [vmem:[%s2847_s3 + $0x4] ss:$8 sps:$4 sm:$0xff]  }
   0x7   :  { %v2279_v19 = vld [vmem:[%s2847_s3] ss:$8 sps:$4 sm:$0xff]   ;;  %637 = vmatprep.subr.bf16.mxu1 %v2272_v17  ;;  %v2287_v20 = vld [vmem:[%s2847_s3 + $0x14] ss:$8 sps:$4 sm:$0xff]   ;;  %793 = vmatprep.subr.bf16.mxu0 %v2272_v17  ;;  %v2294_v21 = vld [vmem:[%s2847_s3 + $0x10] ss:$8 sps:$4 sm:$0xff]  }
   0x8   :  { %1988 = vmatmul.mubr.msk.f32.gmra.mrb[2].mxu0 %vm42_vm1, %v28_v4  ;;  %638 = vmatpush1.bf16.msra.mxu1 %v2279_v19  ;;  %v2301_v22 = vld [vmem:[%s2847_s3 + $0x24] ss:$8 sps:$4 sm:$0xff]   ;;  %v2308_v23 = vld [vmem:[%s2847_s3 + $0x20] ss:$8 sps:$4 sm:$0xff]   ;;  %v2315_v24 = vld [vmem:[%s2847_s3 + $0x34] ss:$8 sps:$4 sm:$0xff]  }
   0x9   :  { %1990 = vmatprep.mubr.msk.f32.mxu0 %vm42_vm1, %v29_v5  ;;  %794 = vmatpush1.bf16.msra.mxu0 %v2279_v19  ;;  %v2322_v25 = vld [vmem:[%s2847_s3 + $0x30] ss:$8 sps:$4 sm:$0xff]   ;;  %v315_v40 = vld [vmem:[%s2848_s2] ss:$8 sm:$0x3] }
   0xa   :  { %639 = vmatprep.subr.bf16.mxu1 %v2287_v20  ;;  %795 = vmatprep.subr.bf16.mxu0 %v2287_v20  ;;  %v2370_v43 = vrot.slane %v315_v40, %v398_v41  ;;  %v1928_v48 = vld [vmem:[%s2848_s2 + $0x10] ss:$8 sm:$0x3]  ;;  %v2380_v58 = vrot.slane %v315_v40, %v402_v57  ;;  %v1929_v59 = vld [vmem:[%s2848_s2 + $0x20] ss:$8 sm:$0x3] }
   0xb   :  { %v2378_v50 = vrot.slane %v1928_v48, %v398_v41  ;;  %v2387_v61 = vrot.slane %v1929_v59, %v398_v41  ;;  %v2393_v0 = vrot.slane %v1929_v59, %v402_v57  ;;  %v2395_v1 = vrot.slane %v1928_v48, %v402_v57  ;;  %s2163_s2 = smov 64  }
   0xc   :  { %1991 = vmatmul.mubr.msk.f32.gmra.mrb[4].mxu0 %vm42_vm1, %v30_v6  ;;  %640 = vmatpush1.bf16.msra.mxu1 %v2294_v21 }
   0xd   :  { %1993 = vmatprep.mubr.msk.f32.mxu0 %vm42_vm1, %v31_v7  ;;  %796 = vmatpush1.bf16.msra.mxu0 %v2294_v21 }
   0xe   :  { %641 = vmatprep.subr.bf16.mxu1 %v2301_v22  ;;  %797 = vmatprep.subr.bf16.mxu0 %v2301_v22 }
  0x10   :  { %1994 = vmatmul.mubr.msk.f32.gmra.mrb[6].mxu0 %vm42_vm1, %v32_v8  ;;  %642 = vmatpush1.bf16.msra.mxu1 %v2308_v23 }
  0x11   :  { %1996 = vmatprep.mubr.msk.f32.mxu0 %vm42_vm1, %v33_v9  ;;  %798 = vmatpush1.bf16.msra.mxu0 %v2308_v23 }
  0x12   :  { %643 = vmatprep.subr.bf16.mxu1 %v2315_v24  ;;  %799 = vmatprep.subr.bf16.mxu0 %v2315_v24 }
  0x14   :  { %1997 = vmatmul.mubr.msk.f32.gmra.mrb[8].mxu0 %vm42_vm1, %v34_v10  ;;  %644 = vmatpush1.bf16.msra.mxu1 %v2322_v25 }
  0x15   :  { %1999 = vmatprep.mubr.msk.f32.mxu0 %vm42_vm1, %v35_v11  ;;  %800 = vmatpush1.bf16.msra.mxu0 %v2322_v25 }
  0x16   :  { %715 = vmatprep.subr.bf16.mxu1 %v2272_v17  ;;  %949 = vmatprep.subr.bf16.mxu0 %v2272_v17 }
  0x17   :  { %670 = vmatmul.mubr.bf16.vlgmr.msra.gmra.mrb[0].mxu1 %v2161_v18 }
  0x18   :  { %2000 = vmatmul.mubr.msk.f32.gmra.mrb[10].mxu0 %vm42_vm1, %v36_v12  ;;  %716 = vmatpush1.bf16.msra.mxu1 %v2279_v19 }
  0x19   :  { %2002 = vmatprep.mubr.msk.f32.mxu0 %vm42_vm1, %v37_v13  ;;  %747 = vmatprep.mubr.bf16.mxu1 %v2161_v18 }
  0x1a   :  { %717 = vmatprep.subr.bf16.mxu1 %v2287_v20 }
  0x1c   :  { %2003 = vmatmul.mubr.msk.f32.gmra.mrb[12].mxu0 %vm42_vm1, %v38_v14  ;;  %718 = vmatpush1.bf16.msra.mxu1 %v2294_v21 }
  0x1d   :  { %2005 = vmatprep.mubr.msk.f32.mxu0 %vm42_vm1, %v39_v15  ;;  %719 = vmatprep.subr.bf16.mxu1 %v2301_v22 }
  0x20   :  { %2006 = vmatmul.mubr.msk.f32.gmra.mrb[14].mxu0 %vm42_vm1, %v40_v16  ;;  %720 = vmatpush1.bf16.msra.mxu1 %v2308_v23 }
  0x21   :  { %825 = vmatprep.mubr.bf16.mxu0 %v2161_v18  ;;  %721 = vmatprep.subr.bf16.mxu1 %v2315_v24 }
  0x24   :  { %722 = vmatpush1.bf16.msra.mxu1 %v2322_v25 }
  0x25   :  { %871 = vmatprep.subr.bf16.mxu1 %v2272_v17 }
  0xd7   :  { %v2341_v26 = vpop.f32.mrb[0].mxu0 }
  0xd8   :  { %255 = vrot.lane.b32.xlu0 %v2341_v26, %s2162_s20  ;;  %v161_v27 = vpop.f32.mrb[1].mxu0 }
  0xdb   :  { %v2345_v28 = vpop.f32.mrb[2].mxu0 }
  0xdc   :  { %v2347_v29 = vpop.f32.mrb[3].mxu0 }
  0xdf   :  { %v2349_v30 = vpop.f32.mrb[4].mxu0 }
  0xe0   :  { %v2351_v31 = vpop.f32.mrb[5].mxu0 }
  0xe3   :  { %v2353_v32 = vpop.f32.mrb[6].mxu0 }
  0xe4   :  { %v2355_v33 = vpop.f32.mrb[7].mxu0 }
  0xe7   :  { %v2357_v34 = vpop.f32.mrb[8].mxu0 }
  0xe8   :  { %v2359_v35 = vpop.f32.mrb[9].mxu0 }
  0xea   :  { %v671_v51 = vpop.f32.mrb[0].mxu1 }
  0xeb   :  { %v2361_v37 = vpop.f32.mrb[10].mxu0  ;;  %v673_v54 = vpop.f32.mrb[1].mxu1 }
  0xec   :  { %v2363_v39 = vpop.f32.mrb[11].mxu0  ;;  %v675_v55 = vpop.f32.mrb[2].mxu1 }
  0xed   :  { %v676_v56 = vpop.f32.mrb[3].mxu1 }
  0xef   :  { %v2368_v42 = vpop.f32.mrb[12].mxu0 }
  0xf0   :  { %v2372_v44 = vpop.f32.mrb[13].mxu0 }
  0xf3   :  { %v2007_v45 = vpop.f32.mrb[14].mxu0 }
  0xf4   :  { %283 = vrot.lane.b32.xlu0 %v2007_v45, %s2162_s20  ;;  %v231_v46 = vpop.f32.mrb[15].mxu0 }
 0x14a   :  { %v256_v47 = vpop.permute.xlu0 %255 }
 0x14b   :  { %v300_v49 = vadd.f32 %v256_v47, %v161_v27 }
 0x14d   :  { %322 = vperm.xlu1 %2045, %v300_v49  }
 0x166   :  { %v284_v52 = vpop.permute.xlu0 %283 }
 0x167   :  { %v314_v53 = vadd.f32 %v284_v52, %v231_v46 }
 0x169   :  { %392 = vperm.xlu1 %2045, %v314_v53  }
 0x1cc   :  { %v2385_v60 = vpop.permute.xlu1 %322 }
 0x1cd   :  { %v406_v62 = vmul.f32 %v2370_v43, %v2385_v60  ;;  %v407_v63 = vmul.f32 %v2380_v58, %v2385_v60 }
 0x1cf   :  { %v447_v3 = vadd.f32 %v2387_v61, %v406_v62  ;;  %v448_v5 = vadd.f32 %v2393_v0, %v407_v63 }
 0x1e8   :  { %v2397_v2 = vpop.permute.xlu1 %392 }
 0x1e9   :  { %v546_v4 = vmul.f32 %v2378_v50, %v2397_v2  ;;  %v547_v6 = vmul.f32 %v2395_v1, %v2397_v2 }
 0x1eb   :  { %v591_v7 = vadd.f32 %v546_v4, %v447_v3  ;;  %v592_v8 = vadd.f32 %v547_v6, %v448_v5 }
 0x1ed   :  { %v679_v9 = vadd.f32 %v673_v54, %v592_v8  ;;  %v678_v10 = vadd.f32 %v671_v51, %v591_v7 }
 0x1ef   :  { %2059 = vtanh.f32 %v679_v9 }
 0x1f0   :  { %2061 = vtanh.f32 %v678_v10 }
 0x1f9   :  { %v2060_v11 = vpop.eup %2059 }
 0x1fa   :  { %688 = vrot.lane.b32.xlu0 %v2060_v11, %s2163_s2  ;;  %v2062_v12 = vpop.eup %2061  ;;  %v684_v47 = vmul.f32 0.5, %v2060_v11 }
 0x1fb   :  { %v682_v13 = vmul.f32 0.5, %v2062_v12 }
 0x1fc   :  { %v685_v48 = vadd.f32 0.5, %v684_v47 }
 0x1fd   :  { %v683_v14 = vadd.f32 0.5, %v682_v13 }
 0x1ff   :  { %v686_v27 = vmul.f32 0.0, %v683_v14 }
 0x26c   :  { %v689_v15 = vpop.permute.xlu0 %688 }
 0x26d   :  { %v691_v16 = vmul.f32 %v689_v15, %v683_v14 }
 0x26f   :  { %693 = vrot.lane.b32.xlu1 %v691_v16, %s2163_s2 }
 0x273   :  { %257 = vrot.lane.b32.xlu1 %v2347_v29, %s2162_s20 }
 0x2e1   :  { %v694_v36 = vpop.permute.xlu1 %693 }
 0x2e2   :  { %v696_v38 = vadd.f32 %v694_v36, %v686_v27 }
 0x2e4   :  { %2063 = vtanh.f32 %v696_v38 }
 0x2e5   :  { %v258_v40 = vpop.permute.xlu1 %257 }
 0x2e6   :  { %v301_v41 = vadd.f32 %v2341_v26, %v258_v40 }
 0x2e8   :  { %327 = vperm.xlu1 %2045, %v301_v41  }
 0x2ee   :  { %v2064_v45 = vpop.eup %2063 }
 0x2ef   :  { %699 = vrot.lane.b32.xlu0 %v2064_v45, %s2163_s2 }
 0x2f3   :  { %281 = vrot.lane.b32.xlu0 %v231_v46, %s2162_s20 }
 0x361   :  { %v700_v49 = vpop.permute.xlu0 %699 }
 0x362   :  { %v702_v51 = vmul.f32 %v700_v49, %v685_v48 }
 0x364   :  { %v711_v52 = vpack.c.bf16 %v702_v51, %v702_v51 }
 0x365   :  { %v282_v53 = vpop.permute.xlu0 %281 }
 0x366   :  { %v313_v54 = vadd.f32 %v2368_v42, %v282_v53  ;;  %1938 = vmatmul.mubr.msk.bf16.vlgmr.msra.gmra.mrb[4].mxu1 %vm633_vm2, %v711_v52 }
 0x367   :  { %872 = vmatpush1.bf16.msra.mxu1 %v2279_v19  ;;  %903 = vmatprep.mubr.bf16.mxu1 %v2161_v18  ;;  %v2423_v26 = vpop.permute.xlu1 %327 }
 0x368   :  { %387 = vperm.xlu0 %2046, %v313_v54   ;;  %873 = vmatprep.subr.bf16.mxu1 %v2287_v20  ;;  %v409_v55 = vmul.f32 %v2380_v58, %v2423_v26  ;;  %v408_v7 = vmul.f32 %v2370_v43, %v2423_v26 }
 0x36a   :  { %v450_v57 = vadd.f32 %v2393_v0, %v409_v55  ;;  %v449_v9 = vadd.f32 %v2387_v61, %v408_v7 }
 0x36b   :  { %874 = vmatpush1.bf16.msra.mxu1 %v2294_v21 }
 0x36c   :  { %875 = vmatprep.subr.bf16.mxu1 %v2301_v22 }
 0x36f   :  { %876 = vmatpush1.bf16.msra.mxu1 %v2308_v23 }
 0x370   :  { %877 = vmatprep.subr.bf16.mxu1 %v2315_v24 }
 0x373   :  { %878 = vmatpush1.bf16.msra.mxu1 %v2322_v25 }
 0x374   :  { %1027 = vmatprep.subr.bf16.mxu1 %v2272_v17 }
 0x3e7   :  { %v2425_v46 = vpop.permute.xlu0 %387 }
 0x3e8   :  { %v545_v56 = vmul.f32 %v2395_v1, %v2425_v46  ;;  %v544_v8 = vmul.f32 %v2378_v50, %v2425_v46 }
 0x3ea   :  { %v710_v62 = vadd.f32 %v545_v56, %v450_v57  ;;  %v709_v10 = vadd.f32 %v544_v8, %v449_v9 }
 0x439   :  { %v749_v59 = vpop.f32.mrb[4].mxu1 }
 0x43a   :  { %v751_v63 = vpop.f32.mrb[5].mxu1  ;;  %v756_v11 = vadd.f32 %v749_v59, %v709_v10 }
 0x43b   :  { %v757_v3 = vadd.f32 %v751_v63, %v710_v62  ;;  %v753_v4 = vpop.f32.mrb[6].mxu1 }
 0x43c   :  { %v754_v5 = vpop.f32.mrb[7].mxu1 }
 0x43d   :  { %2065 = vtanh.f32 %v757_v3 }
 0x43e   :  { %2067 = vtanh.f32 %v756_v11 }
 0x447   :  { %v2066_v6 = vpop.eup %2065 }
 0x448   :  { %766 = vrot.lane.b32.xlu1 %v2066_v6, %s2163_s2  ;;  %v2068_v12 = vpop.eup %2067  ;;  %v762_v48 = vmul.f32 0.5, %v2066_v6 }
 0x449   :  { %v760_v13 = vmul.f32 0.5, %v2068_v12 }
 0x44a   :  { %v763_v49 = vadd.f32 0.5, %v762_v48 }
 0x44b   :  { %v761_v14 = vadd.f32 0.5, %v760_v13 }
 0x44d   :  { %v764_v27 = vmul.f32 %v761_v14, %v696_v38 }
 0x4ba   :  { %v767_v15 = vpop.permute.xlu1 %766 }
 0x4bb   :  { %v769_v16 = vmul.f32 %v767_v15, %v761_v14 }
 0x4bd   :  { %771 = vrot.lane.b32.xlu1 %v769_v16, %s2163_s2 }
 0x4c1   :  { %259 = vrot.lane.b32.xlu1 %v2345_v28, %s2162_s20 }
 0x52f   :  { %v772_v36 = vpop.permute.xlu1 %771 }
 0x530   :  { %v774_v40 = vadd.f32 %v772_v36, %v764_v27 }
 0x532   :  { %2069 = vtanh.f32 %v774_v40 }
 0x533   :  { %v260_v41 = vpop.permute.xlu1 %259 }
 0x534   :  { %v302_v45 = vadd.f32 %v260_v41, %v2347_v29 }
 0x536   :  { %332 = vperm.xlu1 %2045, %v302_v45  }
 0x53c   :  { %v2070_v47 = vpop.eup %2069 }
 0x53d   :  { %777 = vrot.lane.b32.xlu0 %v2070_v47, %s2163_s2 }
 0x541   :  { %279 = vrot.lane.b32.xlu0 %v2368_v42, %s2162_s20 }
 0x5af   :  { %v778_v51 = vpop.permute.xlu0 %777 }
 0x5b0   :  { %v780_v52 = vmul.f32 %v778_v51, %v763_v49 }
 0x5b2   :  { %v789_v53 = vpack.c.bf16 %v780_v52, %v780_v52 }
 0x5b3   :  { %v280_v54 = vpop.permute.xlu0 %279 }
 0x5b4   :  { %v312_v38 = vadd.f32 %v280_v54, %v2372_v44  ;;  %1939 = vmatmul.mubr.msk.bf16.vlgmr.msra.gmra.mrb[16].mxu0 %vm633_vm2, %v789_v53 }
 0x5b5   :  { %950 = vmatpush1.bf16.msra.mxu0 %v2279_v19  ;;  %981 = vmatprep.mubr.bf16.mxu0 %v2161_v18  ;;  %v2456_v29 = vpop.permute.xlu1 %332 }
 0x5b6   :  { %382 = vperm.xlu0 %2046, %v312_v38   ;;  %951 = vmatprep.subr.bf16.mxu0 %v2287_v20  ;;  %v411_v55 = vmul.f32 %v2380_v58, %v2456_v29  ;;  %v410_v7 = vmul.f32 %v2370_v43, %v2456_v29 }
 0x5b8   :  { %v452_v57 = vadd.f32 %v2393_v0, %v411_v55  ;;  %v451_v9 = vadd.f32 %v2387_v61, %v410_v7 }
 0x5b9   :  { %952 = vmatpush1.bf16.msra.mxu0 %v2294_v21 }
 0x5ba   :  { %953 = vmatprep.subr.bf16.mxu0 %v2301_v22 }
 0x5bd   :  { %954 = vmatpush1.bf16.msra.mxu0 %v2308_v23 }
 0x5be   :  { %955 = vmatprep.subr.bf16.mxu0 %v2315_v24 }
 0x5c1   :  { %956 = vmatpush1.bf16.msra.mxu0 %v2322_v25 }
 0x5c2   :  { %1105 = vmatprep.subr.bf16.mxu0 %v2272_v17 }
 0x635   :  { %v2458_v42 = vpop.permute.xlu0 %382 }
 0x636   :  { %v543_v56 = vmul.f32 %v2395_v1, %v2458_v42  ;;  %v542_v8 = vmul.f32 %v2378_v50, %v2458_v42 }
 0x638   :  { %v788_v62 = vadd.f32 %v543_v56, %v452_v57  ;;  %v787_v10 = vadd.f32 %v542_v8, %v451_v9 }
 0x687   :  { %v827_v59 = vpop.f32.mrb[16].mxu0 }
 0x688   :  { %v829_v63 = vpop.f32.mrb[17].mxu0  ;;  %v834_v11 = vadd.f32 %v827_v59, %v787_v10 }
 0x689   :  { %v835_v3 = vadd.f32 %v829_v63, %v788_v62  ;;  %v831_v4 = vpop.f32.mrb[18].mxu0 }
 0x68a   :  { %v832_v5 = vpop.f32.mrb[19].mxu0 }
 0x68b   :  { %2071 = vtanh.f32 %v835_v3 }
 0x68c   :  { %2073 = vtanh.f32 %v834_v11 }
 0x695   :  { %v2072_v6 = vpop.eup %2071 }
 0x696   :  { %844 = vrot.lane.b32.xlu1 %v2072_v6, %s2163_s2  ;;  %v2074_v12 = vpop.eup %2073  ;;  %v840_v49 = vmul.f32 0.5, %v2072_v6 }
 0x697   :  { %v838_v13 = vmul.f32 0.5, %v2074_v12 }
 0x698   :  { %v841_v51 = vadd.f32 0.5, %v840_v49 }
 0x699   :  { %v839_v14 = vadd.f32 0.5, %v838_v13 }
 0x69b   :  { %v842_v27 = vmul.f32 %v839_v14, %v774_v40 }
 0x708   :  { %v845_v15 = vpop.permute.xlu1 %844 }
 0x709   :  { %v847_v16 = vmul.f32 %v845_v15, %v839_v14 }
 0x70b   :  { %849 = vrot.lane.b32.xlu0 %v847_v16, %s2163_s2 }
 0x70f   :  { %261 = vrot.lane.b32.xlu0 %v2351_v31, %s2162_s20 }
 0x77d   :  { %v850_v36 = vpop.permute.xlu0 %849 }
 0x77e   :  { %v852_v41 = vadd.f32 %v850_v36, %v842_v27 }
 0x780   :  { %2075 = vtanh.f32 %v852_v41 }
 0x781   :  { %v262_v45 = vpop.permute.xlu0 %261 }
 0x782   :  { %v303_v47 = vadd.f32 %v2345_v28, %v262_v45 }
 0x784   :  { %337 = vperm.xlu0 %2046, %v303_v47  }
 0x78a   :  { %v2076_v48 = vpop.eup %2075 }
 0x78b   :  { %855 = vrot.lane.b32.xlu1 %v2076_v48, %s2163_s2 }
 0x78f   :  { %277 = vrot.lane.b32.xlu1 %v2372_v44, %s2162_s20 }
 0x7fd   :  { %v856_v52 = vpop.permute.xlu1 %855 }
 0x7fe   :  { %v858_v53 = vmul.f32 %v856_v52, %v841_v51 }
 0x800   :  { %v867_v54 = vpack.c.bf16 %v858_v53, %v858_v53 }
 0x801   :  { %v278_v38 = vpop.permute.xlu1 %277 }
 0x802   :  { %v311_v40 = vadd.f32 %v2361_v37, %v278_v38  ;;  %1940 = vmatmul.mubr.msk.bf16.vlgmr.msra.gmra.mrb[8].mxu1 %vm633_vm2, %v867_v54 }
 0x803   :  { %1028 = vmatpush1.bf16.msra.mxu1 %v2279_v19  ;;  %1059 = vmatprep.mubr.bf16.mxu1 %v2161_v18  ;;  %v2489_v28 = vpop.permute.xlu0 %337 }
 0x804   :  { %377 = vperm.xlu1 %2045, %v311_v40   ;;  %1029 = vmatprep.subr.bf16.mxu1 %v2287_v20  ;;  %v413_v55 = vmul.f32 %v2380_v58, %v2489_v28  ;;  %v412_v7 = vmul.f32 %v2370_v43, %v2489_v28 }
 0x806   :  { %v454_v57 = vadd.f32 %v2393_v0, %v413_v55  ;;  %v453_v9 = vadd.f32 %v2387_v61, %v412_v7 }
 0x807   :  { %1030 = vmatpush1.bf16.msra.mxu1 %v2294_v21 }
 0x808   :  { %1031 = vmatprep.subr.bf16.mxu1 %v2301_v22 }
 0x80b   :  { %1032 = vmatpush1.bf16.msra.mxu1 %v2308_v23 }
 0x80c   :  { %1033 = vmatprep.subr.bf16.mxu1 %v2315_v24 }
 0x80f   :  { %1034 = vmatpush1.bf16.msra.mxu1 %v2322_v25 }
 0x810   :  { %1183 = vmatprep.subr.bf16.mxu1 %v2272_v17 }
 0x883   :  { %v2491_v44 = vpop.permute.xlu1 %377 }
 0x884   :  { %v541_v56 = vmul.f32 %v2395_v1, %v2491_v44  ;;  %v540_v8 = vmul.f32 %v2378_v50, %v2491_v44 }
 0x886   :  { %v866_v62 = vadd.f32 %v541_v56, %v454_v57  ;;  %v865_v10 = vadd.f32 %v540_v8, %v453_v9 }
 0x8d5   :  { %v905_v59 = vpop.f32.mrb[8].mxu1 }
 0x8d6   :  { %v907_v63 = vpop.f32.mrb[9].mxu1  ;;  %v912_v11 = vadd.f32 %v905_v59, %v865_v10 }
 0x8d7   :  { %v913_v3 = vadd.f32 %v907_v63, %v866_v62  ;;  %v909_v4 = vpop.f32.mrb[10].mxu1 }
 0x8d8   :  { %v910_v5 = vpop.f32.mrb[11].mxu1 }
 0x8d9   :  { %2077 = vtanh.f32 %v913_v3 }
 0x8da   :  { %2079 = vtanh.f32 %v912_v11 }
 0x8e3   :  { %v2078_v6 = vpop.eup %2077 }
 0x8e4   :  { %922 = vrot.lane.b32.xlu0 %v2078_v6, %s2163_s2  ;;  %v2080_v12 = vpop.eup %2079  ;;  %v918_v51 = vmul.f32 0.5, %v2078_v6 }
 0x8e5   :  { %v916_v13 = vmul.f32 0.5, %v2080_v12 }
 0x8e6   :  { %v919_v52 = vadd.f32 0.5, %v918_v51 }
 0x8e7   :  { %v917_v14 = vadd.f32 0.5, %v916_v13 }
 0x8e9   :  { %v920_v27 = vmul.f32 %v917_v14, %v852_v41 }
 0x956   :  { %v923_v15 = vpop.permute.xlu0 %922 }
 0x957   :  { %v925_v16 = vmul.f32 %v923_v15, %v917_v14 }
 0x959   :  { %927 = vrot.lane.b32.xlu1 %v925_v16, %s2163_s2 }
 0x95d   :  { %263 = vrot.lane.b32.xlu1 %v2349_v30, %s2162_s20 }
 0x9cb   :  { %v928_v36 = vpop.permute.xlu1 %927 }
 0x9cc   :  { %v930_v45 = vadd.f32 %v928_v36, %v920_v27 }
 0x9ce   :  { %2081 = vtanh.f32 %v930_v45 }
 0x9cf   :  { %v264_v47 = vpop.permute.xlu1 %263 }
 0x9d0   :  { %v304_v48 = vadd.f32 %v264_v47, %v2351_v31 }
 0x9d2   :  { %342 = vperm.xlu1 %2045, %v304_v48  }
 0x9d8   :  { %v2082_v49 = vpop.eup %2081 }
 0x9d9   :  { %933 = vrot.lane.b32.xlu0 %v2082_v49, %s2163_s2 }
 0x9dd   :  { %275 = vrot.lane.b32.xlu0 %v2361_v37, %s2162_s20 }
 0xa4b   :  { %v934_v53 = vpop.permute.xlu0 %933 }
 0xa4c   :  { %v936_v54 = vmul.f32 %v934_v53, %v919_v52 }
 0xa4e   :  { %v945_v38 = vpack.c.bf16 %v936_v54, %v936_v54 }
 0xa4f   :  { %v276_v40 = vpop.permute.xlu0 %275 }
 0xa50   :  { %v310_v41 = vadd.f32 %v276_v40, %v2363_v39  ;;  %1941 = vmatmul.mubr.msk.bf16.vlgmr.msra.gmra.mrb[20].mxu0 %vm633_vm2, %v945_v38 }
 0xa51   :  { %1106 = vmatpush1.bf16.msra.mxu0 %v2279_v19  ;;  %1137 = vmatprep.mubr.bf16.mxu0 %v2161_v18  ;;  %v2522_v31 = vpop.permute.xlu1 %342 }
 0xa52   :  { %372 = vperm.xlu0 %2046, %v310_v41   ;;  %1107 = vmatprep.subr.bf16.mxu0 %v2287_v20  ;;  %v415_v55 = vmul.f32 %v2380_v58, %v2522_v31  ;;  %v414_v7 = vmul.f32 %v2370_v43, %v2522_v31 }
 0xa54   :  { %v456_v57 = vadd.f32 %v2393_v0, %v415_v55  ;;  %v455_v9 = vadd.f32 %v2387_v61, %v414_v7 }
 0xa55   :  { %1108 = vmatpush1.bf16.msra.mxu0 %v2294_v21 }
 0xa56   :  { %1109 = vmatprep.subr.bf16.mxu0 %v2301_v22 }
 0xa59   :  { %1110 = vmatpush1.bf16.msra.mxu0 %v2308_v23 }
 0xa5a   :  { %1111 = vmatprep.subr.bf16.mxu0 %v2315_v24 }
 0xa5d   :  { %1112 = vmatpush1.bf16.msra.mxu0 %v2322_v25 }
 0xa5e   :  { %1261 = vmatprep.subr.bf16.mxu0 %v2272_v17 }
 0xad1   :  { %v2524_v37 = vpop.permute.xlu0 %372 }
 0xad2   :  { %v539_v56 = vmul.f32 %v2395_v1, %v2524_v37  ;;  %v538_v8 = vmul.f32 %v2378_v50, %v2524_v37 }
 0xad4   :  { %v944_v62 = vadd.f32 %v539_v56, %v456_v57  ;;  %v943_v10 = vadd.f32 %v538_v8, %v455_v9 }
 0xb23   :  { %v983_v59 = vpop.f32.mrb[20].mxu0 }
 0xb24   :  { %v985_v63 = vpop.f32.mrb[21].mxu0  ;;  %v990_v11 = vadd.f32 %v983_v59, %v943_v10 }
 0xb25   :  { %v991_v3 = vadd.f32 %v985_v63, %v944_v62  ;;  %v987_v4 = vpop.f32.mrb[22].mxu0 }
 0xb26   :  { %v988_v5 = vpop.f32.mrb[23].mxu0 }
 0xb27   :  { %2083 = vtanh.f32 %v991_v3 }
 0xb28   :  { %2085 = vtanh.f32 %v990_v11 }
 0xb31   :  { %v2084_v6 = vpop.eup %2083 }
 0xb32   :  { %1000 = vrot.lane.b32.xlu1 %v2084_v6, %s2163_s2  ;;  %v2086_v12 = vpop.eup %2085  ;;  %v996_v52 = vmul.f32 0.5, %v2084_v6 }
 0xb33   :  { %v994_v13 = vmul.f32 0.5, %v2086_v12 }
 0xb34   :  { %v997_v53 = vadd.f32 0.5, %v996_v52 }
 0xb35   :  { %v995_v14 = vadd.f32 0.5, %v994_v13 }
 0xb37   :  { %v998_v27 = vmul.f32 %v995_v14, %v930_v45 }
 0xba4   :  { %v1001_v15 = vpop.permute.xlu1 %1000 }
 0xba5   :  { %v1003_v16 = vmul.f32 %v1001_v15, %v995_v14 }
 0xba7   :  { %1005 = vrot.lane.b32.xlu0 %v1003_v16, %s2163_s2 }
 0xbab   :  { %265 = vrot.lane.b32.xlu0 %v2355_v33, %s2162_s20 }
 0xc19   :  { %v1006_v36 = vpop.permute.xlu0 %1005 }
 0xc1a   :  { %v1008_v47 = vadd.f32 %v1006_v36, %v998_v27 }
 0xc1c   :  { %2087 = vtanh.f32 %v1008_v47 }
 0xc1d   :  { %v266_v48 = vpop.permute.xlu0 %265 }
 0xc1e   :  { %v305_v49 = vadd.f32 %v2349_v30, %v266_v48 }
 0xc20   :  { %347 = vperm.xlu0 %2046, %v305_v49  }
 0xc26   :  { %v2088_v51 = vpop.eup %2087 }
 0xc27   :  { %1011 = vrot.lane.b32.xlu1 %v2088_v51, %s2163_s2 }
 0xc2b   :  { %273 = vrot.lane.b32.xlu1 %v2363_v39, %s2162_s20 }
 0xc99   :  { %v1012_v54 = vpop.permute.xlu1 %1011 }
 0xc9a   :  { %v1014_v38 = vmul.f32 %v1012_v54, %v997_v53 }
 0xc9c   :  { %v1023_v40 = vpack.c.bf16 %v1014_v38, %v1014_v38 }
 0xc9d   :  { %v274_v41 = vpop.permute.xlu1 %273 }
 0xc9e   :  { %v309_v45 = vadd.f32 %v2357_v34, %v274_v41  ;;  %1942 = vmatmul.mubr.msk.bf16.vlgmr.msra.gmra.mrb[12].mxu1 %vm633_vm2, %v1023_v40 }
 0xc9f   :  { %1184 = vmatpush1.bf16.msra.mxu1 %v2279_v19  ;;  %1215 = vmatprep.mubr.bf16.mxu1 %v2161_v18  ;;  %v2555_v30 = vpop.permute.xlu0 %347 }
 0xca0   :  { %367 = vperm.xlu1 %2045, %v309_v45   ;;  %1185 = vmatprep.subr.bf16.mxu1 %v2287_v20  ;;  %v417_v55 = vmul.f32 %v2380_v58, %v2555_v30  ;;  %v416_v7 = vmul.f32 %v2370_v43, %v2555_v30 }
 0xca2   :  { %v458_v57 = vadd.f32 %v2393_v0, %v417_v55  ;;  %v457_v9 = vadd.f32 %v2387_v61, %v416_v7 }
 0xca3   :  { %1186 = vmatpush1.bf16.msra.mxu1 %v2294_v21 }
 0xca4   :  { %1187 = vmatprep.subr.bf16.mxu1 %v2301_v22 }
 0xca7   :  { %1188 = vmatpush1.bf16.msra.mxu1 %v2308_v23 }
 0xca8   :  { %1189 = vmatprep.subr.bf16.mxu1 %v2315_v24 }
 0xcab   :  { %1190 = vmatpush1.bf16.msra.mxu1 %v2322_v25 }
 0xcac   :  { %1339 = vmatprep.subr.bf16.mxu1 %v2272_v17 }
 0xd1f   :  { %v2557_v39 = vpop.permute.xlu1 %367 }
 0xd20   :  { %v537_v56 = vmul.f32 %v2395_v1, %v2557_v39  ;;  %v536_v8 = vmul.f32 %v2378_v50, %v2557_v39 }
 0xd22   :  { %v1022_v62 = vadd.f32 %v537_v56, %v458_v57  ;;  %v1021_v10 = vadd.f32 %v536_v8, %v457_v9 }
 0xd71   :  { %v1061_v59 = vpop.f32.mrb[12].mxu1 }
 0xd72   :  { %v1063_v63 = vpop.f32.mrb[13].mxu1  ;;  %v1068_v11 = vadd.f32 %v1061_v59, %v1021_v10 }
 0xd73   :  { %v1069_v3 = vadd.f32 %v1063_v63, %v1022_v62  ;;  %v1065_v4 = vpop.f32.mrb[14].mxu1 }
 0xd74   :  { %v1066_v5 = vpop.f32.mrb[15].mxu1 }
 0xd75   :  { %2089 = vtanh.f32 %v1069_v3 }
 0xd76   :  { %2091 = vtanh.f32 %v1068_v11 }
 0xd7f   :  { %v2090_v6 = vpop.eup %2089 }
 0xd80   :  { %1078 = vrot.lane.b32.xlu0 %v2090_v6, %s2163_s2  ;;  %v2092_v12 = vpop.eup %2091  ;;  %v1074_v53 = vmul.f32 0.5, %v2090_v6 }
 0xd81   :  { %v1072_v13 = vmul.f32 0.5, %v2092_v12 }
 0xd82   :  { %v1075_v54 = vadd.f32 0.5, %v1074_v53 }
 0xd83   :  { %v1073_v14 = vadd.f32 0.5, %v1072_v13 }
 0xd85   :  { %v1076_v27 = vmul.f32 %v1073_v14, %v1008_v47 }
 0xdf2   :  { %v1079_v15 = vpop.permute.xlu0 %1078 }
 0xdf3   :  { %v1081_v16 = vmul.f32 %v1079_v15, %v1073_v14 }
 0xdf5   :  { %1083 = vrot.lane.b32.xlu1 %v1081_v16, %s2163_s2 }
 0xdf9   :  { %267 = vrot.lane.b32.xlu1 %v2353_v32, %s2162_s20 }
 0xe67   :  { %v1084_v36 = vpop.permute.xlu1 %1083 }
 0xe68   :  { %v1086_v48 = vadd.f32 %v1084_v36, %v1076_v27 }
 0xe6a   :  { %2093 = vtanh.f32 %v1086_v48 }
 0xe6b   :  { %v268_v49 = vpop.permute.xlu1 %267 }
 0xe6c   :  { %v306_v51 = vadd.f32 %v268_v49, %v2355_v33 }
 0xe6e   :  { %352 = vperm.xlu1 %2045, %v306_v51  }
 0xe74   :  { %v2094_v52 = vpop.eup %2093 }
 0xe75   :  { %1089 = vrot.lane.b32.xlu0 %v2094_v52, %s2163_s2 }
 0xe79   :  { %271 = vrot.lane.b32.xlu0 %v2357_v34, %s2162_s20 }
 0xee7   :  { %v1090_v38 = vpop.permute.xlu0 %1089 }
 0xee8   :  { %v1092_v40 = vmul.f32 %v1090_v38, %v1075_v54 }
 0xeea   :  { %v1101_v41 = vpack.c.bf16 %v1092_v40, %v1092_v40 }
 0xeeb   :  { %v272_v45 = vpop.permute.xlu0 %271 }
 0xeec   :  { %v308_v47 = vadd.f32 %v272_v45, %v2359_v35  ;;  %1943 = vmatmul.mubr.msk.bf16.vlgmr.msra.gmra.mrb[24].mxu0 %vm633_vm2, %v1101_v41 }
 0xeed   :  { %1262 = vmatpush1.bf16.msra.mxu0 %v2279_v19  ;;  %1293 = vmatprep.mubr.bf16.mxu0 %v2161_v18  ;;  %v2588_v33 = vpop.permute.xlu1 %352 }
 0xeee   :  { %362 = vperm.xlu0 %2046, %v308_v47   ;;  %1263 = vmatprep.subr.bf16.mxu0 %v2287_v20  ;;  %v419_v55 = vmul.f32 %v2380_v58, %v2588_v33  ;;  %v418_v7 = vmul.f32 %v2370_v43, %v2588_v33 }
 0xef0   :  { %v460_v57 = vadd.f32 %v2393_v0, %v419_v55  ;;  %v459_v9 = vadd.f32 %v2387_v61, %v418_v7 }
 0xef1   :  { %1264 = vmatpush1.bf16.msra.mxu0 %v2294_v21 }
 0xef2   :  { %1265 = vmatprep.subr.bf16.mxu0 %v2301_v22 }
 0xef5   :  { %1266 = vmatpush1.bf16.msra.mxu0 %v2308_v23 }
 0xef6   :  { %1267 = vmatprep.subr.bf16.mxu0 %v2315_v24 }
 0xef9   :  { %1268 = vmatpush1.bf16.msra.mxu0 %v2322_v25 }
 0xefa   :  { %1417 = vmatprep.subr.bf16.mxu0 %v2272_v17 }
 0xf6d   :  { %v2590_v34 = vpop.permute.xlu0 %362 }
 0xf6e   :  { %v535_v56 = vmul.f32 %v2395_v1, %v2590_v34  ;;  %v534_v8 = vmul.f32 %v2378_v50, %v2590_v34 }
 0xf70   :  { %v1100_v62 = vadd.f32 %v535_v56, %v460_v57  ;;  %v1099_v10 = vadd.f32 %v534_v8, %v459_v9 }
 0xfbf   :  { %v1139_v59 = vpop.f32.mrb[24].mxu0 }
 0xfc0   :  { %v1141_v63 = vpop.f32.mrb[25].mxu0  ;;  %v1146_v11 = vadd.f32 %v1139_v59, %v1099_v10 }
 0xfc1   :  { %v1147_v3 = vadd.f32 %v1141_v63, %v1100_v62  ;;  %v1143_v4 = vpop.f32.mrb[26].mxu0 }
 0xfc2   :  { %v1144_v5 = vpop.f32.mrb[27].mxu0 }
 0xfc3   :  { %2095 = vtanh.f32 %v1147_v3 }
 0xfc4   :  { %2097 = vtanh.f32 %v1146_v11 }
 0xfcd   :  { %v2096_v6 = vpop.eup %2095 }
 0xfce   :  { %1156 = vrot.lane.b32.xlu1 %v2096_v6, %s2163_s2  ;;  %v2098_v12 = vpop.eup %2097  ;;  %v1152_v54 = vmul.f32 0.5, %v2096_v6 }
 0xfcf   :  { %v1150_v13 = vmul.f32 0.5, %v2098_v12 }
 0xfd0   :  { %v1153_v38 = vadd.f32 0.5, %v1152_v54 }
 0xfd1   :  { %v1151_v14 = vadd.f32 0.5, %v1150_v13 }
 0xfd3   :  { %v1154_v27 = vmul.f32 %v1151_v14, %v1086_v48 }
0x1040   :  { %v1157_v15 = vpop.permute.xlu1 %1156 }
0x1041   :  { %v1159_v16 = vmul.f32 %v1157_v15, %v1151_v14 }
0x1043   :  { %1161 = vrot.lane.b32.xlu0 %v1159_v16, %s2163_s2 }
0x1047   :  { %269 = vrot.lane.b32.xlu0 %v2359_v35, %s2162_s20 }
0x10b5   :  { %v1162_v36 = vpop.permute.xlu0 %1161 }
0x10b6   :  { %v1164_v49 = vadd.f32 %v1162_v36, %v1154_v27 }
0x10b8   :  { %2099 = vtanh.f32 %v1164_v49 }
0x10b9   :  { %v270_v52 = vpop.permute.xlu0 %269 }
0x10ba   :  { %v307_v53 = vadd.f32 %v2353_v32, %v270_v52 }
0x10c2   :  { %v2100_v51 = vpop.eup %2099 }
0x10c3   :  { %1167 = vrot.lane.b32.xlu1 %v2100_v51, %s2163_s2 }
0x10c7   :  { %357 = vperm.xlu1 %2045, %v307_v53  }
0x1135   :  { %v1168_v40 = vpop.permute.xlu1 %1167 }
0x1136   :  { %v1170_v41 = vmul.f32 %v1168_v40, %v1153_v38 }
0x1138   :  { %v1179_v45 = vpack.c.bf16 %v1170_v41, %v1170_v41  ;;  %v422_v41 = vmul.f32 %v2370_v43, %v2590_v34 }
0x113a   :  { %1944 = vmatmul.mubr.msk.bf16.vlgmr.msra.gmra.mrb[16].mxu1 %vm633_vm2, %v1179_v45  ;;  %v463_v45 = vadd.f32 %v2387_v61, %v422_v41 }
0x113b   :  { %1340 = vmatpush1.bf16.msra.mxu1 %v2279_v19  ;;  %1371 = vmatprep.mubr.bf16.mxu1 %v2161_v18 }
0x113c   :  { %1341 = vmatprep.subr.bf16.mxu1 %v2287_v20 }
0x113f   :  { %1342 = vmatpush1.bf16.msra.mxu1 %v2294_v21 }
0x1140   :  { %1343 = vmatprep.subr.bf16.mxu1 %v2301_v22 }
0x1143   :  { %1344 = vmatpush1.bf16.msra.mxu1 %v2308_v23 }
0x1144   :  { %1345 = vmatprep.subr.bf16.mxu1 %v2315_v24 }
0x1146   :  { %v358_v32 = vpop.permute.xlu1 %357 }
0x1147   :  { %1346 = vmatpush1.bf16.msra.mxu1 %v2322_v25  ;;  %v421_v35 = vmul.f32 %v2380_v58, %v358_v32  ;;  %v533_v47 = vmul.f32 %v2395_v1, %v358_v32  ;;  %v420_v4 = vmul.f32 %v2370_v43, %v358_v32  ;;  %v532_v5 = vmul.f32 %v2378_v50, %v358_v32 }
0x1148   :  { %1495 = vmatprep.subr.bf16.mxu1 %v2272_v17  ;;  %v530_v32 = vmul.f32 %v2378_v50, %v2588_v33 }
0x1149   :  { %v462_v48 = vadd.f32 %v2393_v0, %v421_v35  ;;  %v461_v17 = vadd.f32 %v2387_v61, %v420_v4 }
0x114a   :  { %v1255_v35 = vadd.f32 %v530_v32, %v463_v45 }
0x114b   :  { %v1178_v56 = vadd.f32 %v533_v47, %v462_v48  ;;  %v1177_v6 = vadd.f32 %v532_v5, %v461_v17 }
0x120d   :  { %v1217_v55 = vpop.f32.mrb[16].mxu1 }
0x120e   :  { %v1219_v57 = vpop.f32.mrb[17].mxu1  ;;  %v1224_v7 = vadd.f32 %v1217_v55, %v1177_v6 }
0x120f   :  { %v1225_v59 = vadd.f32 %v1219_v57, %v1178_v56  ;;  %v1221_v62 = vpop.f32.mrb[18].mxu1 }
0x1210   :  { %v1222_v63 = vpop.f32.mrb[19].mxu1 }
0x1211   :  { %2101 = vtanh.f32 %v1225_v59 }
0x1212   :  { %2103 = vtanh.f32 %v1224_v7  ;;  %v2659_v7 = vld [vmem:[%s2847_s3] ss:$8 sps:$4 sm:$0xff]  }
0x121b   :  { %v2102_v3 = vpop.eup %2101 }
0x121c   :  { %1234 = vrot.lane.b32.xlu0 %v2102_v3, %s2163_s2  ;;  %v2104_v8 = vpop.eup %2103  ;;  %v1230_v27 = vmul.f32 0.5, %v2102_v3 }
0x121d   :  { %v1228_v9 = vmul.f32 0.5, %v2104_v8  ;;  %v2666_v8 = vld [vmem:[%s2847_s3 + $0x14] ss:$8 sps:$4 sm:$0xff]  }
0x121e   :  { %v1231_v36 = vadd.f32 0.5, %v1230_v27 }
0x121f   :  { %v1229_v10 = vadd.f32 0.5, %v1228_v9  ;;  %v2672_v9 = vld [vmem:[%s2847_s3 + $0x10] ss:$8 sps:$4 sm:$0xff]  }
0x1221   :  { %v1232_v13 = vmul.f32 %v1229_v10, %v1164_v49  ;;  %v2639_v49 = vld [vmem:[%s2847_s3 + $0x4] ss:$8 sps:$4 sm:$0xff]  }
0x128e   :  { %v1235_v11 = vpop.permute.xlu0 %1234 }
0x128f   :  { %v1237_v12 = vmul.f32 %v1235_v11, %v1229_v10  ;;  %v2678_v10 = vld [vmem:[%s2847_s3 + $0x24] ss:$8 sps:$4 sm:$0xff]   ;;  %v2684_v11 = vld [vmem:[%s2847_s3 + $0x20] ss:$8 sps:$4 sm:$0xff]  }
0x1291   :  { %1239 = vrot.lane.b32.xlu1 %v1237_v12, %s2163_s2  ;;  %v2690_v12 = vld [vmem:[%s2847_s3 + $0x34] ss:$8 sps:$4 sm:$0xff]  }
0x1303   :  { %v1240_v14 = vpop.permute.xlu1 %1239 }
0x1304   :  { %v1242_v15 = vadd.f32 %v1240_v14, %v1232_v13  ;;  %v2696_v13 = vld [vmem:[%s2847_s3 + $0x30] ss:$8 sps:$4 sm:$0xff]   ;;  %v425_v14 = vmul.f32 %v2380_v58, %v2557_v39 }
0x1306   :  { %2105 = vtanh.f32 %v1242_v15 }
0x1310   :  { %v2106_v16 = vpop.eup %2105 }
0x1311   :  { %1245 = vrot.lane.b32.xlu0 %v2106_v16, %s2163_s2  ;;  %v529_v16 = vmul.f32 %v2395_v1, %v2555_v30 }
0x1383   :  { %v1246_v51 = vpop.permute.xlu0 %1245 }
0x1384   :  { %v1248_v52 = vmul.f32 %v1246_v51, %v1231_v36 }
0x1386   :  { %v1257_v53 = vpack.c.bf16 %v1248_v52, %v1248_v52 }
0x1388   :  { %1945 = vmatmul.mubr.msk.bf16.vlgmr.msra.gmra.mrb[28].mxu0 %vm633_vm2, %v1257_v53 }
0x1389   :  { %1418 = vmatpush1.bf16.msra.mxu0 %v2279_v19  ;;  %1449 = vmatprep.mubr.bf16.mxu0 %v2161_v18  ;;  %v423_v19 = vmul.f32 %v2380_v58, %v2590_v34 }
0x138a   :  { %1419 = vmatprep.subr.bf16.mxu0 %v2287_v20 }
0x138b   :  { %v464_v20 = vadd.f32 %v2393_v0, %v423_v19 }
0x138d   :  { %1420 = vmatpush1.bf16.msra.mxu0 %v2294_v21  ;;  %v531_v21 = vmul.f32 %v2395_v1, %v2588_v33 }
0x138e   :  { %1421 = vmatprep.subr.bf16.mxu0 %v2301_v22 }
0x1391   :  { %1422 = vmatpush1.bf16.msra.mxu0 %v2308_v23  ;;  %v1256_v23 = vadd.f32 %v531_v21, %v464_v20  ;;  %v424_v21 = vmul.f32 %v2370_v43, %v2557_v39 }
0x1392   :  { %1423 = vmatprep.subr.bf16.mxu0 %v2315_v24 }
0x1395   :  { %1424 = vmatpush1.bf16.msra.mxu0 %v2322_v25 }
0x1396   :  { %1573 = vmatprep.subr.bf16.mxu0 %v2639_v49 }
0x145b   :  { %v1295_v22 = vpop.f32.mrb[28].mxu0 }
0x145c   :  { %v1297_v24 = vpop.f32.mrb[29].mxu0  ;;  %v1302_v48 = vadd.f32 %v1295_v22, %v1255_v35  ;;  %v465_v22 = vadd.f32 %v2387_v61, %v424_v21 }
0x145d   :  { %v1303_v54 = vadd.f32 %v1297_v24, %v1256_v23  ;;  %v1299_v25 = vpop.f32.mrb[30].mxu0  ;;  %v528_v23 = vmul.f32 %v2378_v50, %v2555_v30 }
0x145e   :  { %v1300_v38 = vpop.f32.mrb[31].mxu0 }
0x145f   :  { %2107 = vtanh.f32 %v1303_v54  ;;  %v1333_v24 = vadd.f32 %v528_v23, %v465_v22 }
0x1460   :  { %2109 = vtanh.f32 %v1302_v48 }
0x1469   :  { %v2108_v40 = vpop.eup %2107 }
0x146a   :  { %1312 = vrot.lane.b32.xlu1 %v2108_v40, %s2163_s2  ;;  %v2110_v47 = vpop.eup %2109  ;;  %v1308_v4 = vmul.f32 0.5, %v2108_v40 }
0x146b   :  { %v1306_v55 = vmul.f32 0.5, %v2110_v47 }
0x146c   :  { %v1309_v17 = vadd.f32 0.5, %v1308_v4 }
0x146d   :  { %v1307_v56 = vadd.f32 0.5, %v1306_v55 }
0x146f   :  { %v1310_v62 = vmul.f32 %v1307_v56, %v1242_v15  ;;  %v466_v15 = vadd.f32 %v2393_v0, %v425_v14 }
0x1471   :  { %v1334_v36 = vadd.f32 %v529_v16, %v466_v15  ;;  %v526_v15 = vmul.f32 %v2378_v50, %v2522_v31 }
0x14dc   :  { %v1313_v57 = vpop.permute.xlu1 %1312 }
0x14dd   :  { %v1315_v59 = vmul.f32 %v1313_v57, %v1307_v56 }
0x14df   :  { %1317 = vrot.lane.b32.xlu0 %v1315_v59, %s2163_s2  ;;  %v427_v59 = vmul.f32 %v2380_v58, %v2524_v37 }
0x1551   :  { %v1318_v63 = vpop.permute.xlu0 %1317 }
0x1552   :  { %v1320_v3 = vadd.f32 %v1318_v63, %v1310_v62  ;;  %v468_v62 = vadd.f32 %v2393_v0, %v427_v59  ;;  %v527_v63 = vmul.f32 %v2395_v1, %v2522_v31 }
0x1554   :  { %2111 = vtanh.f32 %v1320_v3 }
0x155e   :  { %v2112_v34 = vpop.eup %2111 }
0x155f   :  { %1323 = vrot.lane.b32.xlu1 %v2112_v34, %s2163_s2  ;;  %v1412_v34 = vadd.f32 %v527_v63, %v468_v62 }
0x15d1   :  { %v1324_v33 = vpop.permute.xlu1 %1323 }
0x15d2   :  { %v1326_v5 = vmul.f32 %v1324_v33, %v1309_v17 }
0x15d4   :  { %v1335_v6 = vpack.c.bf16 %v1326_v5, %v1326_v5 }
0x15d6   :  { %1946 = vmatmul.mubr.msk.bf16.vlgmr.msra.gmra.mrb[20].mxu1 %vm633_vm2, %v1335_v6 }
0x15d7   :  { %1496 = vmatpush1.bf16.msra.mxu1 %v2659_v7  ;;  %1527 = vmatprep.mubr.bf16.mxu1 %v2161_v18 }
0x15d8   :  { %1497 = vmatprep.subr.bf16.mxu1 %v2666_v8 }
0x15db   :  { %1498 = vmatpush1.bf16.msra.mxu1 %v2672_v9 }
0x15dc   :  { %1499 = vmatprep.subr.bf16.mxu1 %v2678_v10 }
0x15df   :  { %1500 = vmatpush1.bf16.msra.mxu1 %v2684_v11 }
0x15e0   :  { %1501 = vmatprep.subr.bf16.mxu1 %v2690_v12 }
0x15e3   :  { %1502 = vmatpush1.bf16.msra.mxu1 %v2696_v13 }
0x15e4   :  { %1651 = vmatprep.subr.bf16.mxu1 %v2639_v49 }
0x16a9   :  { %v1373_v27 = vpop.f32.mrb[20].mxu1 }
0x16aa   :  { %v1375_v51 = vpop.f32.mrb[21].mxu1  ;;  %v1380_v54 = vadd.f32 %v1373_v27, %v1333_v24 }
0x16ab   :  { %v1381_v52 = vadd.f32 %v1375_v51, %v1334_v36  ;;  %v1377_v53 = vpop.f32.mrb[22].mxu1 }
0x16ac   :  { %v1378_v19 = vpop.f32.mrb[23].mxu1 }
0x16ad   :  { %2113 = vtanh.f32 %v1381_v52 }
0x16ae   :  { %2115 = vtanh.f32 %v1380_v54 }
0x16b7   :  { %v2114_v20 = vpop.eup %2113 }
0x16b8   :  { %1390 = vrot.lane.b32.xlu0 %v2114_v20, %s2163_s2  ;;  %v2116_v25 = vpop.eup %2115  ;;  %v1386_v47 = vmul.f32 0.5, %v2114_v20 }
0x16b9   :  { %v1384_v38 = vmul.f32 0.5, %v2116_v25 }
0x16ba   :  { %v1387_v55 = vadd.f32 0.5, %v1386_v47 }
0x16bb   :  { %v1385_v40 = vadd.f32 0.5, %v1384_v38  ;;  %v429_v38 = vmul.f32 %v2380_v58, %v2491_v44 }
0x16bd   :  { %v1388_v32 = vmul.f32 %v1385_v40, %v1320_v3 }
0x172a   :  { %v1391_v41 = vpop.permute.xlu0 %1390 }
0x172b   :  { %v1393_v45 = vmul.f32 %v1391_v41, %v1385_v40  ;;  %v470_v40 = vadd.f32 %v2393_v0, %v429_v38  ;;  %v525_v41 = vmul.f32 %v2395_v1, %v2489_v28 }
0x172d   :  { %1395 = vrot.lane.b32.xlu1 %v1393_v45, %s2163_s2 }
0x179f   :  { %v1396_v35 = vpop.permute.xlu1 %1395 }
0x17a0   :  { %v1398_v48 = vadd.f32 %v1396_v35, %v1388_v32  ;;  %v1490_v32 = vadd.f32 %v525_v41, %v470_v40 }
0x17a2   :  { %2117 = vtanh.f32 %v1398_v48 }
0x17ac   :  { %v2118_v39 = vpop.eup %2117 }
0x17ad   :  { %1401 = vrot.lane.b32.xlu0 %v2118_v39, %s2163_s2 }
0x181f   :  { %v1402_v30 = vpop.permute.xlu0 %1401 }
0x1820   :  { %v1404_v56 = vmul.f32 %v1402_v30, %v1387_v55  ;;  %v428_v30 = vmul.f32 %v2370_v43, %v2491_v44 }
0x1822   :  { %v1413_v57 = vpack.c.bf16 %v1404_v56, %v1404_v56  ;;  %v469_v56 = vadd.f32 %v2387_v61, %v428_v30 }
0x1824   :  { %1947 = vmatmul.mubr.msk.bf16.vlgmr.msra.gmra.mrb[32].mxu0 %vm633_vm2, %v1413_v57  ;;  %v524_v57 = vmul.f32 %v2378_v50, %v2489_v28 }
0x1825   :  { %1574 = vmatpush1.bf16.msra.mxu0 %v2659_v7  ;;  %1605 = vmatprep.mubr.bf16.mxu0 %v2161_v18 }
0x1826   :  { %1575 = vmatprep.subr.bf16.mxu0 %v2666_v8  ;;  %v1489_v59 = vadd.f32 %v524_v57, %v469_v56 }
0x1829   :  { %1576 = vmatpush1.bf16.msra.mxu0 %v2672_v9 }
0x182a   :  { %1577 = vmatprep.subr.bf16.mxu0 %v2678_v10 }
0x182d   :  { %1578 = vmatpush1.bf16.msra.mxu0 %v2684_v11 }
0x182e   :  { %1579 = vmatprep.subr.bf16.mxu0 %v2690_v12 }
0x1831   :  { %1580 = vmatpush1.bf16.msra.mxu0 %v2696_v13 }
0x1832   :  { %1728 = vmatprep.subr.bf16.mxu0 %v2639_v49  ;;  %v426_v49 = vmul.f32 %v2370_v43, %v2524_v37 }
0x1834   :  { %v467_v14 = vadd.f32 %v2387_v61, %v426_v49 }
0x1836   :  { %v1411_v16 = vadd.f32 %v526_v15, %v467_v14 }
0x18f7   :  { %v1451_v3 = vpop.f32.mrb[32].mxu0 }
0x18f8   :  { %v1453_v4 = vpop.f32.mrb[33].mxu0  ;;  %v1458_v27 = vadd.f32 %v1451_v3, %v1411_v16 }
0x18f9   :  { %v1459_v17 = vadd.f32 %v1453_v4, %v1412_v34  ;;  %v1455_v33 = vpop.f32.mrb[34].mxu0 }
0x18fa   :  { %v1456_v5 = vpop.f32.mrb[35].mxu0 }
0x18fb   :  { %2119 = vtanh.f32 %v1459_v17 }
0x18fc   :  { %2121 = vtanh.f32 %v1458_v27  ;;  %v431_v27 = vmul.f32 %v2380_v58, %v2458_v42 }
0x1905   :  { %v2120_v6 = vpop.eup %2119 }
0x1906   :  { %1468 = vrot.lane.b32.xlu1 %v2120_v6, %s2163_s2  ;;  %v2122_v36 = vpop.eup %2121  ;;  %v1464_v23 = vmul.f32 0.5, %v2120_v6 }
0x1907   :  { %v1462_v51 = vmul.f32 0.5, %v2122_v36  ;;  %v472_v36 = vadd.f32 %v2393_v0, %v431_v27 }
0x1908   :  { %v1465_v24 = vadd.f32 0.5, %v1464_v23 }
0x1909   :  { %v1463_v52 = vadd.f32 0.5, %v1462_v51 }
0x190b   :  { %v1466_v20 = vmul.f32 %v1463_v52, %v1398_v48 }
0x1978   :  { %v1469_v53 = vpop.permute.xlu1 %1468 }
0x1979   :  { %v1471_v19 = vmul.f32 %v1469_v53, %v1463_v52  ;;  %v522_v53 = vmul.f32 %v2378_v50, %v2456_v29 }
0x197b   :  { %1473 = vrot.lane.b32.xlu0 %v1471_v19, %s2163_s2 }
0x19ed   :  { %v1474_v21 = vpop.permute.xlu0 %1473 }
0x19ee   :  { %v1476_v22 = vadd.f32 %v1474_v21, %v1466_v20 }
0x19f0   :  { %2123 = vtanh.f32 %v1476_v22 }
0x19fa   :  { %v2124_v37 = vpop.eup %2123 }
0x19fb   :  { %1479 = vrot.lane.b32.xlu1 %v2124_v37, %s2163_s2 }
0x1a6d   :  { %v1480_v31 = vpop.permute.xlu1 %1479 }
0x1a6e   :  { %v1482_v54 = vmul.f32 %v1480_v31, %v1465_v24 }
0x1a70   :  { %v1491_v25 = vpack.c.bf16 %v1482_v54, %v1482_v54 }
0x1a72   :  { %1948 = vmatmul.mubr.msk.bf16.vlgmr.msra.gmra.mrb[24].mxu1 %vm633_vm2, %v1491_v25 }
0x1a73   :  { %1652 = vmatpush1.bf16.msra.mxu1 %v2659_v7  ;;  %1683 = vmatprep.mubr.bf16.mxu1 %v2161_v18 }
0x1a74   :  { %1653 = vmatprep.subr.bf16.mxu1 %v2666_v8 }
0x1a77   :  { %1654 = vmatpush1.bf16.msra.mxu1 %v2672_v9 }
0x1a78   :  { %1655 = vmatprep.subr.bf16.mxu1 %v2678_v10 }
0x1a7b   :  { %1656 = vmatpush1.bf16.msra.mxu1 %v2684_v11 }
0x1a7c   :  { %1657 = vmatprep.subr.bf16.mxu1 %v2690_v12 }
0x1a7f   :  { %1658 = vmatpush1.bf16.msra.mxu1 %v2696_v13 }
0x1b45   :  { %v1529_v45 = vpop.f32.mrb[24].mxu1 }
0x1b46   :  { %v1531_v35 = vpop.f32.mrb[25].mxu1  ;;  %v1536_v62 = vadd.f32 %v1529_v45, %v1489_v59 }
0x1b47   :  { %v1537_v48 = vadd.f32 %v1531_v35, %v1490_v32  ;;  %v1533_v39 = vpop.f32.mrb[26].mxu1  ;;  %v433_v32 = vmul.f32 %v2380_v58, %v2425_v46 }
0x1b48   :  { %v1534_v47 = vpop.f32.mrb[27].mxu1 }
0x1b49   :  { %2125 = vtanh.f32 %v1537_v48  ;;  %v474_v35 = vadd.f32 %v2393_v0, %v433_v32  ;;  %v521_v48 = vmul.f32 %v2395_v1, %v2423_v26 }
0x1b4a   :  { %2127 = vtanh.f32 %v1536_v62  ;;  %v432_v62 = vmul.f32 %v2370_v43, %v2425_v46 }
0x1b4b   :  { %v1646_v47 = vadd.f32 %v521_v48, %v474_v35  ;;  %v2166_v35 = vmov 0.0  }
0x1b53   :  { %v2126_v55 = vpop.eup %2125 }
0x1b54   :  { %1546 = vrot.lane.b32.xlu0 %v2126_v55, %s2163_s2  ;;  %v2128_v63 = vpop.eup %2127  ;;  %v1542_v49 = vmul.f32 0.5, %v2126_v55 }
0x1b55   :  { %v1540_v3 = vmul.f32 0.5, %v2128_v63  ;;  %v473_v63 = vadd.f32 %v2387_v61, %v432_v62 }
0x1b56   :  { %v1543_v14 = vadd.f32 0.5, %v1542_v49 }
0x1b57   :  { %v1541_v34 = vadd.f32 0.5, %v1540_v3  ;;  %v520_v3 = vmul.f32 %v2378_v50, %v2423_v26 }
0x1b59   :  { %v1544_v33 = vmul.f32 %v1541_v34, %v1476_v22 }
0x1bc6   :  { %v1547_v4 = vpop.permute.xlu0 %1546 }
0x1bc7   :  { %v1549_v17 = vmul.f32 %v1547_v4, %v1541_v34  ;;  %v1645_v34 = vadd.f32 %v520_v3, %v473_v63 }
0x1bc9   :  { %1551 = vrot.lane.b32.xlu1 %v1549_v17, %s2163_s2 }
0x1c3b   :  { %v1552_v5 = vpop.permute.xlu1 %1551 }
0x1c3c   :  { %v1554_v6 = vadd.f32 %v1552_v5, %v1544_v33 }
0x1c3e   :  { %2129 = vtanh.f32 %v1554_v6 }
0x1c48   :  { %v2130_v44 = vpop.eup %2129 }
0x1c49   :  { %1557 = vrot.lane.b32.xlu0 %v2130_v44, %s2163_s2 }
0x1cbb   :  { %v1558_v28 = vpop.permute.xlu0 %1557 }
0x1cbc   :  { %v1560_v15 = vmul.f32 %v1558_v28, %v1543_v14 }
0x1cbe   :  { %v1569_v16 = vpack.c.bf16 %v1560_v15, %v1560_v15 }
0x1cc0   :  { %1949 = vmatmul.mubr.msk.bf16.vlgmr.msra.gmra.mrb[36].mxu0 %vm633_vm2, %v1569_v16 }
0x1cc1   :  { %1729 = vmatpush1.bf16.msra.mxu0 %v2659_v7  ;;  %1760 = vmatprep.mubr.bf16.mxu0 %v2161_v18  ;;  %v523_v18 = vmul.f32 %v2395_v1, %v2456_v29 }
0x1cc2   :  { %1730 = vmatprep.subr.bf16.mxu0 %v2666_v8 }
0x1cc3   :  { %v1568_v8 = vadd.f32 %v523_v18, %v472_v36  ;;  %v434_v18 = vmul.f32 %v2370_v43, %v2397_v2 }
0x1cc5   :  { %1731 = vmatpush1.bf16.msra.mxu0 %v2672_v9 }
0x1cc6   :  { %1732 = vmatprep.subr.bf16.mxu0 %v2678_v10 }
0x1cc9   :  { %1733 = vmatpush1.bf16.msra.mxu0 %v2684_v11 }
0x1cca   :  { %1734 = vmatprep.subr.bf16.mxu0 %v2690_v12  ;;  %v430_v12 = vmul.f32 %v2370_v43, %v2458_v42 }
0x1ccd   :  { %1735 = vmatpush1.bf16.msra.mxu0 %v2696_v13  ;;  %v471_v13 = vadd.f32 %v2387_v61, %v430_v12 }
0x1ccf   :  { %v1567_v19 = vadd.f32 %v522_v53, %v471_v13 }
0x1d93   :  { %v1607_v7 = vpop.f32.mrb[36].mxu0 }
0x1d94   :  { %v1609_v51 = vpop.f32.mrb[37].mxu0  ;;  %v1614_v20 = vadd.f32 %v1607_v7, %v1567_v19  ;;  %v435_v7 = vmul.f32 %v2380_v58, %v2397_v2 }
0x1d95   :  { %v1615_v9 = vadd.f32 %v1609_v51, %v1568_v8  ;;  %v1611_v52 = vpop.f32.mrb[38].mxu0  ;;  %v475_v8 = vadd.f32 %v2387_v61, %v434_v18 }
0x1d96   :  { %v1612_v10 = vpop.f32.mrb[39].mxu0  ;;  %v476_v51 = vadd.f32 %v2393_v0, %v435_v7  ;;  %v519_v52 = vmul.f32 %v2395_v1, %v2385_v60  ;;  %v1794_v1 = vld [vmem:[%s2849_s4] sm:$0xff] }
0x1d97   :  { %2131 = vtanh.f32 %v1615_v9  ;;  %v518_v9 = vmul.f32 %v2378_v50, %v2385_v60  ;;  %v2164_v60 = vmov 0.0|0.0  }
0x1d98   :  { %2133 = vtanh.f32 %v1614_v20  ;;  %v1723_v12 = vadd.f32 %v519_v52, %v476_v51  ;;  %2027 = vmatprep.subr.bf16.mxu1 %v2164_v60 }
0x1d99   :  { %v1722_v10 = vadd.f32 %v518_v9, %v475_v8 }
0x1da1   :  { %v2132_v11 = vpop.eup %2131 }
0x1da2   :  { %1624 = vrot.lane.b32.xlu1 %v2132_v11, %s2163_s2  ;;  %v2134_v21 = vpop.eup %2133  ;;  %v1620_v38 = vmul.f32 0.5, %v2132_v11 }
0x1da3   :  { %v1618_v22 = vmul.f32 0.5, %v2134_v21 }
0x1da4   :  { %v1621_v40 = vadd.f32 0.5, %v1620_v38 }
0x1da5   :  { %v1619_v37 = vadd.f32 0.5, %v1618_v22  ;;  %v1795_v22 = vld [vmem:[%s2849_s4 + $0x8] sm:$0xff] }
0x1da7   :  { %v1622_v31 = vmul.f32 %v1619_v37, %v1554_v6 }
0x1e14   :  { %v1625_v23 = vpop.permute.xlu1 %1624 }
0x1e15   :  { %v1627_v24 = vmul.f32 %v1625_v23, %v1619_v37  ;;  %v1796_v37 = vld [vmem:[%s2849_s4 + $0x10] sm:$0xff]  ;;  %v2028_v23 = vpack.c.bf16 %v1795_v22, %v1794_v1 }
0x1e17   :  { %1629 = vrot.lane.b32.xlu0 %v1627_v24, %s2163_s2  ;;  %v1797_v24 = vld [vmem:[%s2849_s4 + $0x18] sm:$0xff] }
0x1e89   :  { %v1630_v54 = vpop.permute.xlu0 %1629 }
0x1e8a   :  { %v1632_v25 = vadd.f32 %v1630_v54, %v1622_v31  ;;  %v2031_v31 = vpack.c.bf16 %v1797_v24, %v1796_v37  ;;  %v1798_v54 = vld [vmem:[%s2849_s4 + $0x20] sm:$0xff] }
0x1e8c   :  { %2135 = vtanh.f32 %v1632_v25 }
0x1e96   :  { %v2136_v42 = vpop.eup %2135 }
0x1e97   :  { %1635 = vrot.lane.b32.xlu1 %v2136_v42, %s2163_s2 }
0x1f09   :  { %v1636_v29 = vpop.permute.xlu1 %1635 }
0x1f0a   :  { %v1638_v41 = vmul.f32 %v1636_v29, %v1621_v40 }
0x1f0c   :  { %v1647_v45 = vpack.c.bf16 %v1638_v41, %v1638_v41  ;;  %v1800_v41 = vld [vmem:[%s2849_s4 + $0x30] sm:$0xff] }
0x1f0e   :  { %1950 = vmatmul.mubr.msk.bf16.vlgmr.msra.gmra.mrb[28].mxu1 %vm633_vm2, %v1647_v45  ;;  %v1801_v45 = vld [vmem:[%s2849_s4 + $0x38] sm:$0xff] }
0x1f0f   :  { %2029 = vmatpush3.bf16.msra.mxu1 %v2028_v23  ;;  %v2037_v32 = vpack.c.bf16 %v1801_v45, %v1800_v41  ;;  %2024 = vmatprep.mubr.msk.f32.mxu1 %vm2165_vm3, %v2166_v35 }
0x1f10   :  { %2030 = vmatprep.subr.bf16.mxu1 %v2164_v60 }
0x1f13   :  { %2032 = vmatpush3.bf16.msra.mxu1 %v2031_v31 }
0x1f14   :  { %2033 = vmatprep.subr.bf16.mxu1 %v2164_v60 }
0x1fe1   :  { %v1685_v39 = vpop.f32.mrb[28].mxu1 }
0x1fe2   :  { %v1687_v55 = vpop.f32.mrb[29].mxu1  ;;  %v1692_v4 = vadd.f32 %v1685_v39, %v1645_v34 }
0x1fe3   :  { %v1693_v30 = vadd.f32 %v1687_v55, %v1646_v47  ;;  %v1689_v56 = vpop.f32.mrb[30].mxu1 }
0x1fe4   :  { %v1690_v57 = vpop.f32.mrb[31].mxu1 }
0x1fe5   :  { %2137 = vtanh.f32 %v1693_v30 }
0x1fe6   :  { %2139 = vtanh.f32 %v1692_v4  ;;  %v1954_v4 = vld [vmem:[%s2849_s4 + $0x48] ss:$0 sm:$0xff] }
0x1fef   :  { %v2138_v59 = vpop.eup %2137 }
0x1ff0   :  { %1702 = vrot.lane.b32.xlu0 %v2138_v59, %s2163_s2  ;;  %v2140_v17 = vpop.eup %2139  ;;  %v1698_v15 = vmul.f32 0.5, %v2138_v59  ;;  %v1952_v59 = vld [vmem:[%s2849_s4 + $0x40] ss:$0 sm:$0xff] }
0x1ff1   :  { %v1696_v33 = vmul.f32 0.5, %v2140_v17 }
0x1ff2   :  { %v1699_v16 = vadd.f32 0.5, %v1698_v15 }
0x1ff3   :  { %v1697_v5 = vadd.f32 0.5, %v1696_v33 }
0x1ff5   :  { %v1700_v49 = vmul.f32 %v1697_v5, %v1632_v25  ;;  %v1799_v25 = vld [vmem:[%s2849_s4 + $0x28] sm:$0xff] }
0x1ff6   :  { %v2034_v42 = vpack.c.bf16 %v1799_v25, %v1798_v54 }
0x1ff8   :  { %2035 = vmatpush3.bf16.msra.mxu1 %v2034_v42 }
0x1ff9   :  { %2036 = vmatprep.subr.bf16.mxu1 %v2164_v60 }
0x1ffc   :  { %2038 = vmatpush3.bf16.msra.mxu1 %v2037_v32 }
0x2062   :  { %v1703_v6 = vpop.permute.xlu0 %1702 }
0x2063   :  { %v1705_v44 = vmul.f32 %v1703_v6, %v1697_v5  ;;  %v1897_v6 = vstv %s2850_s5 }
0x2065   :  { %1707 = vrot.lane.b32.xlu1 %v1705_v44, %s2163_s2 }
0x20d7   :  { %v1708_v14 = vpop.permute.xlu1 %1707 }
0x20d8   :  { %v1710_v28 = vadd.f32 %v1708_v14, %v1700_v49 }
0x20da   :  { %2141 = vtanh.f32 %v1710_v28 }
0x20e4   :  { %v2142_v46 = vpop.eup %2141 }
0x20e5   :  { %1713 = vrot.lane.b32.xlu0 %v2142_v46, %s2163_s2 }
0x2157   :  { %v1714_v26 = vpop.permute.xlu0 %1713 }
0x2158   :  { %v1716_v27 = vmul.f32 %v1714_v26, %v1699_v16 }
0x215a   :  { %v1724_v36 = vpack.c.bf16 %v1716_v27, %v1716_v27 }
0x215c   :  { %1951 = vmatmul.mubr.msk.bf16.vlgmr.msra.gmra.mrb[40].mxu0 %vm633_vm2, %v1724_v36 }
0x222f   :  { %v1762_v11 = vpop.f32.mrb[40].mxu0 }
0x2230   :  { %v1769_v13 = vadd.f32 %v1762_v11, %v1722_v10  ;;  %v1764_v53 = vpop.f32.mrb[41].mxu0 }
0x2231   :  { %v1770_v19 = vadd.f32 %v1764_v53, %v1723_v12  ;;  %v1766_v43 = vpop.f32.mrb[42].mxu0 }
0x2232   :  { %v1767_v20 = vpop.f32.mrb[43].mxu0 }
0x2233   :  { %2143 = vtanh.f32 %v1770_v19 }
0x2234   :  { %2145 = vtanh.f32 %v1769_v13 }
0x223d   :  { %v2144_v58 = vpop.eup %2143 }
0x223e   :  { %1779 = vrot.lane.b32.xlu1 %v2144_v58, %s2163_s2  ;;  %v2146_v61 = vpop.eup %2145  ;;  %v1775_v39 = vmul.f32 0.5, %v2144_v58 }
0x223f   :  { %v1773_v0 = vmul.f32 0.5, %v2146_v61 }
0x2240   :  { %v1776_v47 = vadd.f32 0.5, %v1775_v39 }
0x2241   :  { %v1774_v2 = vadd.f32 0.5, %v1773_v0 }
0x2243   :  { %v1777_v38 = vmul.f32 %v1774_v2, %v1710_v28 }
0x22b0   :  { %v1780_v50 = vpop.permute.xlu1 %1779 }
0x22b1   :  { %v1782_v21 = vmul.f32 %v1780_v50, %v1774_v2 }
0x22b3   :  { %1784 = vrot.lane.b32.xlu0 %v1782_v21, %s2163_s2 }
0x2325   :  { %v1785_v40 = vpop.permute.xlu0 %1784 }
0x2326   :  { %v1787_v29 = vadd.f32 %v1785_v40, %v1777_v38 }
0x2328   :  { %2147 = vtanh.f32 %v1787_v29 }
0x2332   :  { %v2148_v48 = vpop.eup %2147 }
0x2333   :  { %1790 = vrot.lane.b32.xlu1 %v2148_v48, %s2163_s2 }
0x23a5   :  { %v1791_v55 = vpop.permute.xlu1 %1790 }
0x23a6   :  { %v1793_v30 = vmul.f32 %v1791_v55, %v1776_v47 }
0x23a8   :  { %vm1805_vm4 = vcmp.ge.f32.partialorder %v1793_v30, 0.0  ;;  %v1806_v56 = vmul.f32 0.3, %v1793_v30 }
0x23aa   :  { %v1807_v57 = vsel %vm1805_vm4, %v1793_v30, %v1806_v56 }
0x23ab   :  { %2025 = vmatmul.mubr.msk.f32.vlgmr.msra.gmra.mrb[32].mxu1 %vm633_vm2, %v1807_v57 }
0x247e   :  { %v1881_v62 = vpop.f32.mrb[32].mxu1 }
0x247f   :  { %v1882_v63 = vadd.f32 %v1952_v59, %v1881_v62  ;;  %v2026_v3 = vpop.f32.mrb[33].mxu1 }
0x2481   :  { %vm1885_vm5 = vcmp.ge.f32.partialorder %v1882_v63, 0.0  ;;  %v1886_v34 = vmul.f32 0.3, %v1882_v63 }
0x2483   :  { %v1887_v17 = vsel %vm1885_vm5, %v1882_v63, %v1886_v34 }
0x2484   :  { %v1892_v33 = vmul.f32 %v1954_v4, %v1887_v17 }
0x2486   :  { %v1894_v5 = vsel %vm1893_vm6, %v1892_v33, 0.0 }
0x2487   :  { %1895 = vadd.xlane.f32.xlu0 %v1894_v5 }
0x2514   :  { %v1896_v44 = vpop.xlane.xlu0 %1895 }
0x2515   :  { %v1898_v49 = vadd.f32 %v1897_v6, %v1896_v44 }
0x2517   :  { %v1955_v14 = vmul.f32 -1.442695, %v1898_v49 }
0x2519   :  { %2149 = vpow2.f32 %v1955_v14 }
0x2523   :  { %v2150_v28 = vpop.eup %2149 }
0x2524   :  { %v1902_v46 = vadd.f32 1.0, %v2150_v28 }
0x2526   :  { %2151 = vrcp.f32 %v1902_v46 }
0x2530   :  { %v2152_v15 = vpop.eup %2151 }
0x2531   :  { %1906 = vst.msk [vmem:[%s2851_s6] sm:$0xff] %vm1905_vm7, %v2152_v15 }

</bundles_post_ra>
